<compile_context>
chip_gen: v7x
topology: tpu7x:2x2x1
jax: 0.10.0
libtpu: 0.0.40
codegen_flags: <defaults>
</compile_context>

<pallas_src>
import functools
import math

import jax
import jax.numpy as jnp
from jax import lax
from jax.experimental import pallas as pl
from jax.experimental.pallas import tpu as pltpu

EPS = 1e-5


# ----------------------------------------------------------------------------
# In-kernel helpers
# ----------------------------------------------------------------------------
def _layernorm(x, gamma, beta):
    mean = jnp.mean(x, axis=-1, keepdims=True)
    var = jnp.mean((x - mean) ** 2, axis=-1, keepdims=True)
    return gamma * (x - mean) * lax.rsqrt(var + EPS) + beta


def _encoder_block(x2d, w_ref, vec_ref, *, bb, seq, d, f, apply_sigmoid):
    """Single-head post-LN transformer encoder block on bb stacked images.

    x2d:     (bb*seq, d) activations (images stacked along rows).
    w_ref:   (d, 4d+2f) packed weights, columns [ wqkv | wo | w1 | w2^T ];
             the 1/sqrt(d) attention scale is pre-folded into wq / bq.
    vec_ref: (8, max(3d,f)) packed vectors, rows:
             0 bqkv, 1 bo, 2 b1, 3 b2, 4 ln1g, 5 ln1b, 6 ln2g, 7 ln2b.
    """
    o_wo = 3 * d
    o_w1 = 4 * d
    o_w2 = 4 * d + f

    # Fused QKV projection: one N=3d MXU push instead of three N=d pushes.
    qkv = jnp.dot(x2d, w_ref[:, 0:3 * d], preferred_element_type=jnp.float32)
    qkv = qkv + vec_ref[0:1, 0:3 * d]
    q = qkv[:, 0:d].reshape(bb, seq, d)           # sublane split at seq%8==0
    k = qkv[:, d:2 * d].reshape(bb, seq, d)
    v = qkv[:, 2 * d:3 * d].reshape(bb, seq, d)

    # Per-image attention (scale already folded into wq / bq).
    s = jnp.einsum("bqd,bkd->bqk", q, k, preferred_element_type=jnp.float32)
    s = s - jnp.max(s, axis=-1, keepdims=True)
    p = jnp.exp(s)
    attn = p * pl.reciprocal(jnp.sum(p, axis=-1, keepdims=True), approx=True)
    ctx = jnp.einsum("bqk,bkd->bqd", attn, v, preferred_element_type=jnp.float32)
    ctx = ctx.reshape(bb * seq, d)

    attn_out = jnp.dot(ctx, w_ref[:, o_wo:o_wo + d],
                       preferred_element_type=jnp.float32) + vec_ref[1:2, 0:d]
    h = _layernorm(x2d + attn_out, vec_ref[4:5, 0:d], vec_ref[5:6, 0:d])

    ff = jnp.dot(h, w_ref[:, o_w1:o_w1 + f],
                 preferred_element_type=jnp.float32) + vec_ref[2:3, 0:f]
    ff = jnp.maximum(ff, 0.0)                                  # ReLU
    # w2 is stored transposed; contract the last dims (no transpose in-kernel).
    ff = lax.dot_general(ff, w_ref[:, o_w2:o_w2 + f],
                         (((1,), (1,)), ((), ())),
                         preferred_element_type=jnp.float32) + vec_ref[3:4, 0:d]
    out = _layernorm(h + ff, vec_ref[6:7, 0:d], vec_ref[7:8, 0:d])
    if apply_sigmoid:
        out = jax.nn.sigmoid(out)
    return out


def _encoder_kernel(x_ref, cw_ref, cvec_ref, ew_ref, evec_ref, o_ref,
                    *, bb, H, W, F):
    """RGB combinator + encoder block for bb images (rows stacked)."""
    x = x_ref[...]                                              # (bb*H, 3W)
    acc = jnp.dot(x, cw_ref[...], preferred_element_type=jnp.float32)
    acc = acc + cvec_ref[0:1, :]
    feat = _layernorm(acc, cvec_ref[1:2, :], cvec_ref[2:3, :])  # (bb*H, W)
    out = _encoder_block(feat, ew_ref, evec_ref,
                         bb=bb, seq=H, d=W, f=F, apply_sigmoid=False)
    o_ref[...] = out.astype(o_ref.dtype)


def _head_kernel(y_ref, hw_ref, hvec_ref, o_ref, *, bb, H, W, F):
    """Ordinal detection head (sigmoid) for bb images (rows stacked)."""
    out = _encoder_block(y_ref[...], hw_ref, hvec_ref,
                         bb=bb, seq=W, d=H, f=F, apply_sigmoid=True)
    o_ref[...] = out.astype(o_ref.dtype)


# ----------------------------------------------------------------------------
# Parameter packing (one-time, tiny, outside the kernels)
# ----------------------------------------------------------------------------
def _vec_row(v, width):
    v = jnp.asarray(v).reshape(1, -1)
    return jnp.pad(v, ((0, 0), (0, width - v.shape[1])))


def _pack_block(p, d, f):
    scale = 1.0 / math.sqrt(d)                    # fold attention scale into wq/bq
    w = jnp.concatenate([p["wq"] * scale, p["wk"], p["wv"],
                         p["wo"], p["w1"], p["w2"].T], axis=1)   # (d, 4d+2f)
    width = max(3 * d, f)
    bqkv = jnp.concatenate([p["bq"] * scale, p["bk"], p["bv"]], axis=1)
    vec = jnp.concatenate(
        [_vec_row(bqkv, width), _vec_row(p["bo"], width),
         _vec_row(p["b1"], width), _vec_row(p["b2"], width),
         _vec_row(p["ln1g"], width), _vec_row(p["ln1b"], width),
         _vec_row(p["ln2g"], width), _vec_row(p["ln2b"], width)], axis=0)
    return w.astype(jnp.float32), vec.astype(jnp.float32)


# ----------------------------------------------------------------------------
# Wrapper
# ----------------------------------------------------------------------------
def _const_spec(a):
    # Full-array resident block; constant block index => not re-fetched.
    # (On v7x at larger sizes, pipeline_mode=pl.Buffered(1) would single-buffer
    #  these constants; unnecessary at current VMEM footprints.)
    zeros = (0,) * a.ndim
    return pl.BlockSpec(a.shape, lambda i, _z=zeros: _z)


def _pick_block_batch(B):
    """Images stacked per grid step; keep >=2 grid steps for v7x megacore."""
    best = 1
    for bb in range(1, min(B, 8) + 1):
        if B % bb == 0 and B // bb >= 2:
            best = bb
    return best


def _block_flops(S, D, F):
    proj = 4 * 2 * S * D * D
    attn = 2 * 2 * S * S * D
    ffn = 2 * 2 * S * D * F
    return proj + attn + ffn


def vit_object_detection_forward(x, params, *, block_batch=None):
    """Forward pass mirroring VitObjectDetectionNetwork.forward (NCHW input)."""
    B, C, H, W = x.shape
    assert C == 3
    # TODO(synk): ragged H/W (not multiples of 8) would need padded blocks.
    assert H % 8 == 0 and W % 8 == 0

    bb = block_batch if block_batch is not None else _pick_block_batch(B)
    assert B % bb == 0
    steps = B // bb
    f32 = jnp.float32

    F_enc = params["enc"]["w1"].shape[1]
    F_head = params["head"]["w1"].shape[1]

    # ---- parameter packing: 37 tiny arrays -> 5 slabs ----
    comb_w = params["comb"]["w"].reshape(3 * W, W).astype(f32)
    comb_vec = jnp.concatenate(
        [params["comb"]["b"].reshape(1, W),
         params["comb"]["gamma"].reshape(1, W),
         params["comb"]["beta"].reshape(1, W)], axis=0).astype(f32)
    enc_w, enc_vec = _pack_block(params["enc"], d=W, f=F_enc)
    head_w, head_vec = _pack_block(params["head"], d=H, f=F_head)

    # Layout plumbing: NCHW -> (B*H, 3W) so the combinator is one K=3W matmul.
    x_rows = jnp.transpose(x, (0, 2, 1, 3)).reshape(B * H, 3 * W).astype(f32)

    # ---- kernel 1: combinator + encoder block ----
    enc_flops = B * (2 * H * (3 * W) * W + _block_flops(H, W, F_enc))
    enc_bytes = 4 * (x_rows.size + B * H * W + comb_w.size + comb_vec.size
                     + enc_w.size + enc_vec.size)
    feat = pl.pallas_call(
        functools.partial(_encoder_kernel, bb=bb, H=H, W=W, F=F_enc),
        out_shape=jax.ShapeDtypeStruct((B * H, W), f32),
        grid_spec=pltpu.PrefetchScalarGridSpec(
            num_scalar_prefetch=0, grid=(steps,),
            in_specs=[pl.BlockSpec((bb * H, 3 * W), lambda i: (i, 0)),
                      _const_spec(comb_w), _const_spec(comb_vec),
                      _const_spec(enc_w), _const_spec(enc_vec)],
            out_specs=pl.BlockSpec((bb * H, W), lambda i: (i, 0))),
        compiler_params=pltpu.CompilerParams(
            dimension_semantics=("parallel",)),
        cost_estimate=pl.CostEstimate(flops=enc_flops,
                                      transcendentals=B * (H * H + 2 * H),
                                      bytes_accessed=enc_bytes),
    )(x_rows, comb_w, comb_vec, enc_w, enc_vec)

    # PyTorch x.view((B, W, H)): free row-major flat reinterpretation in HBM.
    y = feat.reshape(B * W, H)

    # ---- kernel 2: ordinal detection head (+ sigmoid) ----
    head_flops = B * _block_flops(W, H, F_head)
    head_bytes = 4 * (2 * B * W * H + head_w.size + head_vec.size)
    out = pl.pallas_call(
        functools.partial(_head_kernel, bb=bb, H=H, W=W, F=F_head),
        out_shape=jax.ShapeDtypeStruct((B * W, H), f32),
        grid_spec=pltpu.PrefetchScalarGridSpec(
            num_scalar_prefetch=0, grid=(steps,),
            in_specs=[pl.BlockSpec((bb * W, H), lambda i: (i, 0)),
                      _const_spec(head_w), _const_spec(head_vec)],
            out_specs=pl.BlockSpec((bb * W, H), lambda i: (i, 0))),
        compiler_params=pltpu.CompilerParams(
            dimension_semantics=("parallel",)),
        cost_estimate=pl.CostEstimate(flops=head_flops,
                                      transcendentals=B * (W * W + 2 * W),
                                      bytes_accessed=head_bytes),
    )(y, head_w, head_vec)

    # Final PyTorch .view((B, H, W)): free flat reinterpretation.
    return out.reshape(B, H, W)


# ----------------------------------------------------------------------------
# Deterministic parameter construction
# ----------------------------------------------------------------------------
def _block_params(key, d_model, d_ff, scale=0.02):
    ks = jax.random.split(key, 6)
    f32 = jnp.float32
    return {
        "wq": scale * jax.random.normal(ks[0], (d_model, d_model), f32),
        "bq": jnp.zeros((1, d_model), f32),
        "wk": scale * jax.random.normal(ks[1], (d_model, d_model), f32),
        "bk": jnp.zeros((1, d_model), f32),
        "wv": scale * jax.random.normal(ks[2], (d_model, d_model), f32),
        "bv": jnp.zeros((1, d_model), f32),
        "wo": scale * jax.random.normal(ks[3], (d_model, d_model), f32),
        "bo": jnp.zeros((1, d_model), f32),
        "w1": scale * jax.random.normal(ks[4], (d_model, d_ff), f32),
        "b1": jnp.zeros((1, d_ff), f32),
        "w2": scale * jax.random.normal(ks[5], (d_ff, d_model), f32),
        "b2": jnp.zeros((1, d_model), f32),
        "ln1g": jnp.ones((1, d_model), f32),
        "ln1b": jnp.zeros((1, d_model), f32),
        "ln2g": jnp.ones((1, d_model), f32),
        "ln2b": jnp.zeros((1, d_model), f32),
    }


def init_params(key, H, W, head_ff):
    k_comb, k_enc, k_head = jax.random.split(key, 3)
    comb = {
        "w": 0.02 * jax.random.normal(k_comb, (3, W, W), jnp.float32),
        "b": jnp.zeros((1, W), jnp.float32),
        "gamma": jnp.ones((1, W), jnp.float32),
        "beta": jnp.zeros((1, W), jnp.float32),
    }
    enc = _block_params(k_enc, d_model=W, d_ff=H)          # encoder: d_model = W
    head = _block_params(k_head, d_model=H, d_ff=head_ff)  # head:    d_model = H
    return {"comb": comb, "enc": enc, "head": head}


# ----------------------------------------------------------------------------
# Pure-JAX reference (unpacked params; validates packing + scale folding)
# ----------------------------------------------------------------------------
def _reference_block(x, p, *, apply_sigmoid):
    d = x.shape[-1]
    q = x @ p["wq"] + p["bq"]
    k = x @ p["wk"] + p["bk"]
    v = x @ p["wv"] + p["bv"]
    s = jnp.einsum("bqd,bkd->bqk", q, k) / math.sqrt(d)
    a = jax.nn.softmax(s, axis=-1)
    ctx = jnp.einsum("bqk,bkd->bqd", a, v)
    h = _layernorm(x + (ctx @ p["wo"] + p["bo"]), p["ln1g"], p["ln1b"])
    ff = jnp.maximum(h @ p["w1"] + p["b1"], 0.0) @ p["w2"] + p["b2"]
    out = _layernorm(h + ff, p["ln2g"], p["ln2b"])
    return jax.nn.sigmoid(out) if apply_sigmoid else out


def _reference_forward(x, params):
    B, C, H, W = x.shape
    xt = jnp.transpose(x, (0, 2, 1, 3)).reshape(B, H, 3 * W)
    w = params["comb"]["w"].reshape(3 * W, W)
    feat = xt @ w + params["comb"]["b"]
    feat = _layernorm(feat, params["comb"]["gamma"], params["comb"]["beta"])
    feat = _reference_block(feat, params["enc"], apply_sigmoid=False)
    y = feat.reshape(B, W, H)                      # PyTorch .view semantics
    y = _reference_block(y, params["head"], apply_sigmoid=True)
    return y.reshape(B, H, W)


if __name__ == "__main__":
    B, C, H, W = 2, 3, 16, 32   # expected_image_height=16, expected_image_width=32
    key = jax.random.PRNGKey(0)
    k_x, k_p = jax.random.split(key)
    x = jax.random.normal(k_x, (B, C, H, W), jnp.float32)
    params = init_params(k_p, H, W, head_ff=32)

    fwd = jax.jit(vit_object_detection_forward)
    out = fwd(x, params)
    jax.block_until_ready(out)
    assert out.shape == (B, H, W), out.shape

    ref = jax.jit(_reference_forward)(x, params)
    max_err = float(jnp.max(jnp.abs(out - ref)))
    assert max_err < 1e-2, f"kernel/reference mismatch: {max_err}"
    print("KERNEL_OK")
</pallas_src>

<mosaic_0001>
module attributes {stable_mosaic.version = 11 : i64} {
  func.func @_encoder_kernel(%arg0: i32, %arg1: memref<16x96xf32, #tpu.memory_space<vmem>>, %arg2: memref<96x32xf32, #tpu.memory_space<vmem>>, %arg3: memref<3x32xf32, #tpu.memory_space<vmem>>, %arg4: memref<32x160xf32, #tpu.memory_space<vmem>>, %arg5: memref<8x96xf32, #tpu.memory_space<vmem>>, %arg6: memref<16x32xf32, #tpu.memory_space<vmem>>) attributes {dimension_semantics = [#tpu.dimension_semantics<parallel>], iteration_bounds = array<i64: 2>, scalar_prefetch = 0 : i64, scratch_operands = 0 : i64, tpu.core_type = #tpu.core_type<tc>, window_params = [{transform_indices = @transform_0, window_bounds = array<i64: 16, 96>}, {pipeline_mode = #tpu.pipeline_mode<synchronous>, transform_indices = @transform_1, window_bounds = array<i64: 96, 32>}, {pipeline_mode = #tpu.pipeline_mode<synchronous>, transform_indices = @transform_2, window_bounds = array<i64: 3, 32>}, {pipeline_mode = #tpu.pipeline_mode<synchronous>, transform_indices = @transform_3, window_bounds = array<i64: 32, 160>}, {pipeline_mode = #tpu.pipeline_mode<synchronous>, transform_indices = @transform_4, window_bounds = array<i64: 8, 96>}, {transform_indices = @transform_5, window_bounds = array<i64: 16, 32>}]} {
    %c0 = arith.constant 0 : index
    %c0_0 = arith.constant 0 : index
    %0 = vector.load %arg1[%c0, %c0_0] : memref<16x96xf32, #tpu.memory_space<vmem>>, vector<16x96xf32>
    %c0_1 = arith.constant 0 : index
    %c0_2 = arith.constant 0 : index
    %1 = vector.load %arg2[%c0_1, %c0_2] : memref<96x32xf32, #tpu.memory_space<vmem>>, vector<96x32xf32>
    %cst = arith.constant dense<0.000000e+00> : vector<16x32xf32>
    %2 = tpu.matmul %0, %1, %cst {dimension_numbers = #tpu.dot_dimension_numbers<[1], [0], [0], [1], [0, 0, 1, 1], [], []>} : vector<16x96xf32>, vector<96x32xf32>, vector<16x32xf32> -> vector<16x32xf32>
    %c0_3 = arith.constant 0 : index
    %c0_4 = arith.constant 0 : index
    %3 = vector.load %arg3[%c0_3, %c0_4] : memref<3x32xf32, #tpu.memory_space<vmem>>, vector<1x32xf32>
    %4 = vector.broadcast %3 : vector<1x32xf32> to vector<16x32xf32>
    %5 = arith.addf %2, %4 : vector<16x32xf32>
    %c1 = arith.constant 1 : index
    %c0_5 = arith.constant 0 : index
    %6 = vector.load %arg3[%c1, %c0_5] : memref<3x32xf32, #tpu.memory_space<vmem>>, vector<1x32xf32>
    %c2 = arith.constant 2 : index
    %c0_6 = arith.constant 0 : index
    %7 = vector.load %arg3[%c2, %c0_6] : memref<3x32xf32, #tpu.memory_space<vmem>>, vector<1x32xf32>
    %cst_7 = arith.constant dense<0.000000e+00> : vector<16xf32>
    %8 = vector.multi_reduction <add>, %5, %cst_7 [1] : vector<16x32xf32> to vector<16xf32>
    %9 = vector.shape_cast %8 : vector<16xf32> to vector<16x1xf32>
    %cst_8 = arith.constant 3.200000e+01 : f32
    %10 = vector.broadcast %cst_8 : f32 to vector<16x1xf32>
    %11 = arith.divf %9, %10 : vector<16x1xf32>
    %12 = vector.broadcast %11 : vector<16x1xf32> to vector<16x32xf32>
    %13 = arith.subf %5, %12 : vector<16x32xf32>
    %14 = arith.mulf %13, %13 : vector<16x32xf32>
    %cst_9 = arith.constant dense<0.000000e+00> : vector<16xf32>
    %15 = vector.multi_reduction <add>, %14, %cst_9 [1] : vector<16x32xf32> to vector<16xf32>
    %16 = vector.shape_cast %15 : vector<16xf32> to vector<16x1xf32>
    %cst_10 = arith.constant 3.200000e+01 : f32
    %17 = vector.broadcast %cst_10 : f32 to vector<16x1xf32>
    %18 = arith.divf %16, %17 : vector<16x1xf32>
    %19 = vector.broadcast %11 : vector<16x1xf32> to vector<16x32xf32>
    %20 = arith.subf %5, %19 : vector<16x32xf32>
    %21 = vector.broadcast %6 : vector<1x32xf32> to vector<16x32xf32>
    %22 = arith.mulf %21, %20 : vector<16x32xf32>
    %cst_11 = arith.constant 9.99999974E-6 : f32
    %23 = vector.broadcast %cst_11 : f32 to vector<16x1xf32>
    %24 = arith.addf %18, %23 : vector<16x1xf32>
    %25 = math.rsqrt %24 : vector<16x1xf32>
    %26 = vector.broadcast %25 : vector<16x1xf32> to vector<16x32xf32>
    %27 = arith.mulf %22, %26 : vector<16x32xf32>
    %28 = vector.broadcast %7 : vector<1x32xf32> to vector<16x32xf32>
    %29 = arith.addf %27, %28 : vector<16x32xf32>
    %c0_12 = arith.constant 0 : index
    %c0_13 = arith.constant 0 : index
    %30 = vector.load %arg4[%c0_12, %c0_13] : memref<32x160xf32, #tpu.memory_space<vmem>>, vector<32x96xf32>
    %cst_14 = arith.constant dense<0.000000e+00> : vector<16x96xf32>
    %31 = tpu.matmul %29, %30, %cst_14 {dimension_numbers = #tpu.dot_dimension_numbers<[1], [0], [0], [1], [0, 0, 1, 1], [], []>} : vector<16x32xf32>, vector<32x96xf32>, vector<16x96xf32> -> vector<16x96xf32>
    %c0_15 = arith.constant 0 : index
    %c0_16 = arith.constant 0 : index
    %32 = vector.load %arg5[%c0_15, %c0_16] : memref<8x96xf32, #tpu.memory_space<vmem>>, vector<1x96xf32>
    %33 = vector.broadcast %32 : vector<1x96xf32> to vector<16x96xf32>
    %34 = arith.addf %31, %33 : vector<16x96xf32>
    %35 = vector.extract_strided_slice %34 {offsets = [0, 0], sizes = [16, 32], strides = [1, 1]} : vector<16x96xf32> to vector<16x32xf32>
    %36 = vector.shape_cast %35 : vector<16x32xf32> to vector<1x16x32xf32>
    %37 = vector.extract_strided_slice %34 {offsets = [0, 32], sizes = [16, 32], strides = [1, 1]} : vector<16x96xf32> to vector<16x32xf32>
    %38 = vector.shape_cast %37 : vector<16x32xf32> to vector<1x16x32xf32>
    %39 = vector.extract_strided_slice %34 {offsets = [0, 64], sizes = [16, 32], strides = [1, 1]} : vector<16x96xf32> to vector<16x32xf32>
    %40 = vector.shape_cast %39 : vector<16x32xf32> to vector<1x16x32xf32>
    "tpu.trace_start"() <{level = 10 : i32, message = "bqd,bkd->bqk"}> : () -> ()
    %cst_17 = arith.constant dense<0.000000e+00> : vector<1x16x16xf32>
    %41 = tpu.matmul %36, %38, %cst_17 {dimension_numbers = #tpu.dot_dimension_numbers<[2], [2], [1], [1], [0, 0, 0, 1, 1, 1], [0], [0]>} : vector<1x16x32xf32>, vector<1x16x32xf32>, vector<1x16x16xf32> -> vector<1x16x16xf32>
    "tpu.trace_stop"() : () -> ()
    %cst_18 = arith.constant dense<0xFF800000> : vector<1x16xf32>
    %42 = vector.multi_reduction <maximumf>, %41, %cst_18 [2] : vector<1x16x16xf32> to vector<1x16xf32>
    %43 = vector.shape_cast %42 : vector<1x16xf32> to vector<1x16x1xf32>
    %44 = vector.broadcast %43 : vector<1x16x1xf32> to vector<1x16x16xf32>
    %45 = arith.subf %41, %44 : vector<1x16x16xf32>
    %46 = math.exp %45 : vector<1x16x16xf32>
    %cst_19 = arith.constant dense<0.000000e+00> : vector<1x16xf32>
    %47 = vector.multi_reduction <add>, %46, %cst_19 [2] : vector<1x16x16xf32> to vector<1x16xf32>
    %48 = vector.shape_cast %47 : vector<1x16xf32> to vector<1x16x1xf32>
    %49 = tpu.reciprocal %48 {approx = true} : vector<1x16x1xf32> -> vector<1x16x1xf32>
    %50 = vector.broadcast %49 : vector<1x16x1xf32> to vector<1x16x16xf32>
    %51 = arith.mulf %46, %50 : vector<1x16x16xf32>
    "tpu.trace_start"() <{level = 10 : i32, message = "bqk,bkd->bqd"}> : () -> ()
    %cst_20 = arith.constant dense<0.000000e+00> : vector<1x16x32xf32>
    %52 = tpu.matmul %51, %40, %cst_20 {dimension_numbers = #tpu.dot_dimension_numbers<[2], [1], [1], [2], [0, 0, 0, 1, 1, 2], [0], [0]>} : vector<1x16x16xf32>, vector<1x16x32xf32>, vector<1x16x32xf32> -> vector<1x16x32xf32>
    "tpu.trace_stop"() : () -> ()
    %53 = vector.shape_cast %52 : vector<1x16x32xf32> to vector<16x32xf32>
    %c0_21 = arith.constant 0 : index
    %c96 = arith.constant 96 : index
    %54 = vector.load %arg4[%c0_21, %c96] : memref<32x160xf32, #tpu.memory_space<vmem>>, vector<32x32xf32>
    %cst_22 = arith.constant dense<0.000000e+00> : vector<16x32xf32>
    %55 = tpu.matmul %53, %54, %cst_22 {dimension_numbers = #tpu.dot_dimension_numbers<[1], [0], [0], [1], [0, 0, 1, 1], [], []>} : vector<16x32xf32>, vector<32x32xf32>, vector<16x32xf32> -> vector<16x32xf32>
    %c1_23 = arith.constant 1 : index
    %c0_24 = arith.constant 0 : index
    %56 = vector.load %arg5[%c1_23, %c0_24] : memref<8x96xf32, #tpu.memory_space<vmem>>, vector<1x32xf32>
    %57 = vector.broadcast %56 : vector<1x32xf32> to vector<16x32xf32>
    %58 = arith.addf %55, %57 : vector<16x32xf32>
    %59 = arith.addf %29, %58 : vector<16x32xf32>
    %c4 = arith.constant 4 : index
    %c0_25 = arith.constant 0 : index
    %60 = vector.load %arg5[%c4, %c0_25] : memref<8x96xf32, #tpu.memory_space<vmem>>, vector<1x32xf32>
    %c5 = arith.constant 5 : index
    %c0_26 = arith.constant 0 : index
    %61 = vector.load %arg5[%c5, %c0_26] : memref<8x96xf32, #tpu.memory_space<vmem>>, vector<1x32xf32>
    %cst_27 = arith.constant dense<0.000000e+00> : vector<16xf32>
    %62 = vector.multi_reduction <add>, %59, %cst_27 [1] : vector<16x32xf32> to vector<16xf32>
    %63 = vector.shape_cast %62 : vector<16xf32> to vector<16x1xf32>
    %cst_28 = arith.constant 3.200000e+01 : f32
    %64 = vector.broadcast %cst_28 : f32 to vector<16x1xf32>
    %65 = arith.divf %63, %64 : vector<16x1xf32>
    %66 = vector.broadcast %65 : vector<16x1xf32> to vector<16x32xf32>
    %67 = arith.subf %59, %66 : vector<16x32xf32>
    %68 = arith.mulf %67, %67 : vector<16x32xf32>
    %cst_29 = arith.constant dense<0.000000e+00> : vector<16xf32>
    %69 = vector.multi_reduction <add>, %68, %cst_29 [1] : vector<16x32xf32> to vector<16xf32>
    %70 = vector.shape_cast %69 : vector<16xf32> to vector<16x1xf32>
    %cst_30 = arith.constant 3.200000e+01 : f32
    %71 = vector.broadcast %cst_30 : f32 to vector<16x1xf32>
    %72 = arith.divf %70, %71 : vector<16x1xf32>
    %73 = vector.broadcast %65 : vector<16x1xf32> to vector<16x32xf32>
    %74 = arith.subf %59, %73 : vector<16x32xf32>
    %75 = vector.broadcast %60 : vector<1x32xf32> to vector<16x32xf32>
    %76 = arith.mulf %75, %74 : vector<16x32xf32>
    %cst_31 = arith.constant 9.99999974E-6 : f32
    %77 = vector.broadcast %cst_31 : f32 to vector<16x1xf32>
    %78 = arith.addf %72, %77 : vector<16x1xf32>
    %79 = math.rsqrt %78 : vector<16x1xf32>
    %80 = vector.broadcast %79 : vector<16x1xf32> to vector<16x32xf32>
    %81 = arith.mulf %76, %80 : vector<16x32xf32>
    %82 = vector.broadcast %61 : vector<1x32xf32> to vector<16x32xf32>
    %83 = arith.addf %81, %82 : vector<16x32xf32>
    %c0_32 = arith.constant 0 : index
    %c128 = arith.constant 128 : index
    %84 = vector.load %arg4[%c0_32, %c128] : memref<32x160xf32, #tpu.memory_space<vmem>>, vector<32x16xf32>
    %cst_33 = arith.constant dense<0.000000e+00> : vector<16x16xf32>
    %85 = tpu.matmul %83, %84, %cst_33 {dimension_numbers = #tpu.dot_dimension_numbers<[1], [0], [0], [1], [0, 0, 1, 1], [], []>} : vector<16x32xf32>, vector<32x16xf32>, vector<16x16xf32> -> vector<16x16xf32>
    %c2_34 = arith.constant 2 : index
    %c0_35 = arith.constant 0 : index
    %86 = vector.load %arg5[%c2_34, %c0_35] : memref<8x96xf32, #tpu.memory_space<vmem>>, vector<1x16xf32>
    %87 = vector.broadcast %86 : vector<1x16xf32> to vector<16x16xf32>
    %88 = arith.addf %85, %87 : vector<16x16xf32>
    %cst_36 = arith.constant 0.000000e+00 : f32
    %89 = vector.broadcast %cst_36 : f32 to vector<16x16xf32>
    %90 = arith.maximumf %88, %89 : vector<16x16xf32>
    %c0_37 = arith.constant 0 : index
    %c144 = arith.constant 144 : index
    %91 = vector.load %arg4[%c0_37, %c144] : memref<32x160xf32, #tpu.memory_space<vmem>>, vector<32x16xf32>
    %cst_38 = arith.constant dense<0.000000e+00> : vector<16x32xf32>
    %92 = tpu.matmul %90, %91, %cst_38 {dimension_numbers = #tpu.dot_dimension_numbers<[1], [1], [0], [0], [0, 0, 1, 0], [], []>} : vector<16x16xf32>, vector<32x16xf32>, vector<16x32xf32> -> vector<16x32xf32>
    %c3 = arith.constant 3 : index
    %c0_39 = arith.constant 0 : index
    %93 = vector.load %arg5[%c3, %c0_39] : memref<8x96xf32, #tpu.memory_space<vmem>>, vector<1x32xf32>
    %94 = vector.broadcast %93 : vector<1x32xf32> to vector<16x32xf32>
    %95 = arith.addf %92, %94 : vector<16x32xf32>
    %96 = arith.addf %83, %95 : vector<16x32xf32>
    %c6 = arith.constant 6 : index
    %c0_40 = arith.constant 0 : index
    %97 = vector.load %arg5[%c6, %c0_40] : memref<8x96xf32, #tpu.memory_space<vmem>>, vector<1x32xf32>
    %c7 = arith.constant 7 : index
    %c0_41 = arith.constant 0 : index
    %98 = vector.load %arg5[%c7, %c0_41] : memref<8x96xf32, #tpu.memory_space<vmem>>, vector<1x32xf32>
    %cst_42 = arith.constant dense<0.000000e+00> : vector<16xf32>
    %99 = vector.multi_reduction <add>, %96, %cst_42 [1] : vector<16x32xf32> to vector<16xf32>
    %100 = vector.shape_cast %99 : vector<16xf32> to vector<16x1xf32>
    %cst_43 = arith.constant 3.200000e+01 : f32
    %101 = vector.broadcast %cst_43 : f32 to vector<16x1xf32>
    %102 = arith.divf %100, %101 : vector<16x1xf32>
    %103 = vector.broadcast %102 : vector<16x1xf32> to vector<16x32xf32>
    %104 = arith.subf %96, %103 : vector<16x32xf32>
    %105 = arith.mulf %104, %104 : vector<16x32xf32>
    %cst_44 = arith.constant dense<0.000000e+00> : vector<16xf32>
    %106 = vector.multi_reduction <add>, %105, %cst_44 [1] : vector<16x32xf32> to vector<16xf32>
    %107 = vector.shape_cast %106 : vector<16xf32> to vector<16x1xf32>
    %cst_45 = arith.constant 3.200000e+01 : f32
    %108 = vector.broadcast %cst_45 : f32 to vector<16x1xf32>
    %109 = arith.divf %107, %108 : vector<16x1xf32>
    %110 = vector.broadcast %102 : vector<16x1xf32> to vector<16x32xf32>
    %111 = arith.subf %96, %110 : vector<16x32xf32>
    %112 = vector.broadcast %97 : vector<1x32xf32> to vector<16x32xf32>
    %113 = arith.mulf %112, %111 : vector<16x32xf32>
    %cst_46 = arith.constant 9.99999974E-6 : f32
    %114 = vector.broadcast %cst_46 : f32 to vector<16x1xf32>
    %115 = arith.addf %109, %114 : vector<16x1xf32>
    %116 = math.rsqrt %115 : vector<16x1xf32>
    %117 = vector.broadcast %116 : vector<16x1xf32> to vector<16x32xf32>
    %118 = arith.mulf %113, %117 : vector<16x32xf32>
    %119 = vector.broadcast %98 : vector<1x32xf32> to vector<16x32xf32>
    %120 = arith.addf %118, %119 : vector<16x32xf32>
    %c0_47 = arith.constant 0 : index
    %c0_48 = arith.constant 0 : index
    %121 = vector.load %arg6[%c0_47, %c0_48] : memref<16x32xf32, #tpu.memory_space<vmem>>, vector<16x32xf32>
    tpu.vector_store %arg6[%c0_47, %c0_48], %120 {strides = array<i32>} : memref<16x32xf32, #tpu.memory_space<vmem>>, vector<16x32xf32>,
    return
  }
  func.func @transform_0(%arg0: i32) -> (i32, i32) {
    %c0_i32 = arith.constant 0 : i32
    %c0_i32_0 = arith.constant 0 : i32
    return %arg0, %c0_i32 : i32, i32
  }
  func.func @transform_1(%arg0: i32) -> (i32, i32) {
    %c0_i32 = arith.constant 0 : i32
    %c0_i32_0 = arith.constant 0 : i32
    %c0_i32_1 = arith.constant 0 : i32
    return %c0_i32, %c0_i32_0 : i32, i32
  }
  func.func @transform_2(%arg0: i32) -> (i32, i32) {
    %c0_i32 = arith.constant 0 : i32
    %c0_i32_0 = arith.constant 0 : i32
    %c0_i32_1 = arith.constant 0 : i32
    return %c0_i32, %c0_i32_0 : i32, i32
  }
  func.func @transform_3(%arg0: i32) -> (i32, i32) {
    %c0_i32 = arith.constant 0 : i32
    %c0_i32_0 = arith.constant 0 : i32
    %c0_i32_1 = arith.constant 0 : i32
    return %c0_i32, %c0_i32_0 : i32, i32
  }
  func.func @transform_4(%arg0: i32) -> (i32, i32) {
    %c0_i32 = arith.constant 0 : i32
    %c0_i32_0 = arith.constant 0 : i32
    %c0_i32_1 = arith.constant 0 : i32
    return %c0_i32, %c0_i32_0 : i32, i32
  }
  func.func @transform_5(%arg0: i32) -> (i32, i32) {
    %c0_i32 = arith.constant 0 : i32
    %c0_i32_0 = arith.constant 0 : i32
    return %arg0, %c0_i32 : i32, i32
  }
}

module attributes {stable_mosaic.version = 11 : i64} {
  func.func @_head_kernel(%arg0: i32, %arg1: memref<32x16xf32, #tpu.memory_space<vmem>>, %arg2: memref<16x128xf32, #tpu.memory_space<vmem>>, %arg3: memref<8x48xf32, #tpu.memory_space<vmem>>, %arg4: memref<32x16xf32, #tpu.memory_space<vmem>>) attributes {dimension_semantics = [#tpu.dimension_semantics<parallel>], iteration_bounds = array<i64: 2>, scalar_prefetch = 0 : i64, scratch_operands = 0 : i64, tpu.core_type = #tpu.core_type<tc>, window_params = [{transform_indices = @transform_0, window_bounds = array<i64: 32, 16>}, {pipeline_mode = #tpu.pipeline_mode<synchronous>, transform_indices = @transform_1, window_bounds = array<i64: 16, 128>}, {pipeline_mode = #tpu.pipeline_mode<synchronous>, transform_indices = @transform_2, window_bounds = array<i64: 8, 48>}, {transform_indices = @transform_3, window_bounds = array<i64: 32, 16>}]} {
    %c0 = arith.constant 0 : index
    %c0_0 = arith.constant 0 : index
    %0 = vector.load %arg1[%c0, %c0_0] : memref<32x16xf32, #tpu.memory_space<vmem>>, vector<32x16xf32>
    %c0_1 = arith.constant 0 : index
    %c0_2 = arith.constant 0 : index
    %1 = vector.load %arg2[%c0_1, %c0_2] : memref<16x128xf32, #tpu.memory_space<vmem>>, vector<16x48xf32>
    %cst = arith.constant dense<0.000000e+00> : vector<32x48xf32>
    %2 = tpu.matmul %0, %1, %cst {dimension_numbers = #tpu.dot_dimension_numbers<[1], [0], [0], [1], [0, 0, 1, 1], [], []>} : vector<32x16xf32>, vector<16x48xf32>, vector<32x48xf32> -> vector<32x48xf32>
    %c0_3 = arith.constant 0 : index
    %c0_4 = arith.constant 0 : index
    %3 = vector.load %arg3[%c0_3, %c0_4] : memref<8x48xf32, #tpu.memory_space<vmem>>, vector<1x48xf32>
    %4 = vector.broadcast %3 : vector<1x48xf32> to vector<32x48xf32>
    %5 = arith.addf %2, %4 : vector<32x48xf32>
    %6 = vector.extract_strided_slice %5 {offsets = [0, 0], sizes = [32, 16], strides = [1, 1]} : vector<32x48xf32> to vector<32x16xf32>
    %7 = vector.shape_cast %6 : vector<32x16xf32> to vector<1x32x16xf32>
    %8 = vector.extract_strided_slice %5 {offsets = [0, 16], sizes = [32, 16], strides = [1, 1]} : vector<32x48xf32> to vector<32x16xf32>
    %9 = vector.shape_cast %8 : vector<32x16xf32> to vector<1x32x16xf32>
    %10 = vector.extract_strided_slice %5 {offsets = [0, 32], sizes = [32, 16], strides = [1, 1]} : vector<32x48xf32> to vector<32x16xf32>
    %11 = vector.shape_cast %10 : vector<32x16xf32> to vector<1x32x16xf32>
    "tpu.trace_start"() <{level = 10 : i32, message = "bqd,bkd->bqk"}> : () -> ()
    %cst_5 = arith.constant dense<0.000000e+00> : vector<1x32x32xf32>
    %12 = tpu.matmul %7, %9, %cst_5 {dimension_numbers = #tpu.dot_dimension_numbers<[2], [2], [1], [1], [0, 0, 0, 1, 1, 1], [0], [0]>} : vector<1x32x16xf32>, vector<1x32x16xf32>, vector<1x32x32xf32> -> vector<1x32x32xf32>
    "tpu.trace_stop"() : () -> ()
    %cst_6 = arith.constant dense<0xFF800000> : vector<1x32xf32>
    %13 = vector.multi_reduction <maximumf>, %12, %cst_6 [2] : vector<1x32x32xf32> to vector<1x32xf32>
    %14 = vector.shape_cast %13 : vector<1x32xf32> to vector<1x32x1xf32>
    %15 = vector.broadcast %14 : vector<1x32x1xf32> to vector<1x32x32xf32>
    %16 = arith.subf %12, %15 : vector<1x32x32xf32>
    %17 = math.exp %16 : vector<1x32x32xf32>
    %cst_7 = arith.constant dense<0.000000e+00> : vector<1x32xf32>
    %18 = vector.multi_reduction <add>, %17, %cst_7 [2] : vector<1x32x32xf32> to vector<1x32xf32>
    %19 = vector.shape_cast %18 : vector<1x32xf32> to vector<1x32x1xf32>
    %20 = tpu.reciprocal %19 {approx = true} : vector<1x32x1xf32> -> vector<1x32x1xf32>
    %21 = vector.broadcast %20 : vector<1x32x1xf32> to vector<1x32x32xf32>
    %22 = arith.mulf %17, %21 : vector<1x32x32xf32>
    "tpu.trace_start"() <{level = 10 : i32, message = "bqk,bkd->bqd"}> : () -> ()
    %cst_8 = arith.constant dense<0.000000e+00> : vector<1x32x16xf32>
    %23 = tpu.matmul %22, %11, %cst_8 {dimension_numbers = #tpu.dot_dimension_numbers<[2], [1], [1], [2], [0, 0, 0, 1, 1, 2], [0], [0]>} : vector<1x32x32xf32>, vector<1x32x16xf32>, vector<1x32x16xf32> -> vector<1x32x16xf32>
    "tpu.trace_stop"() : () -> ()
    %24 = vector.shape_cast %23 : vector<1x32x16xf32> to vector<32x16xf32>
    %c0_9 = arith.constant 0 : index
    %c48 = arith.constant 48 : index
    %25 = vector.load %arg2[%c0_9, %c48] : memref<16x128xf32, #tpu.memory_space<vmem>>, vector<16x16xf32>
    %cst_10 = arith.constant dense<0.000000e+00> : vector<32x16xf32>
    %26 = tpu.matmul %24, %25, %cst_10 {dimension_numbers = #tpu.dot_dimension_numbers<[1], [0], [0], [1], [0, 0, 1, 1], [], []>} : vector<32x16xf32>, vector<16x16xf32>, vector<32x16xf32> -> vector<32x16xf32>
    %c1 = arith.constant 1 : index
    %c0_11 = arith.constant 0 : index
    %27 = vector.load %arg3[%c1, %c0_11] : memref<8x48xf32, #tpu.memory_space<vmem>>, vector<1x16xf32>
    %28 = vector.broadcast %27 : vector<1x16xf32> to vector<32x16xf32>
    %29 = arith.addf %26, %28 : vector<32x16xf32>
    %30 = arith.addf %0, %29 : vector<32x16xf32>
    %c4 = arith.constant 4 : index
    %c0_12 = arith.constant 0 : index
    %31 = vector.load %arg3[%c4, %c0_12] : memref<8x48xf32, #tpu.memory_space<vmem>>, vector<1x16xf32>
    %c5 = arith.constant 5 : index
    %c0_13 = arith.constant 0 : index
    %32 = vector.load %arg3[%c5, %c0_13] : memref<8x48xf32, #tpu.memory_space<vmem>>, vector<1x16xf32>
    %cst_14 = arith.constant dense<0.000000e+00> : vector<32xf32>
    %33 = vector.multi_reduction <add>, %30, %cst_14 [1] : vector<32x16xf32> to vector<32xf32>
    %34 = vector.shape_cast %33 : vector<32xf32> to vector<32x1xf32>
    %cst_15 = arith.constant 1.600000e+01 : f32
    %35 = vector.broadcast %cst_15 : f32 to vector<32x1xf32>
    %36 = arith.divf %34, %35 : vector<32x1xf32>
    %37 = vector.broadcast %36 : vector<32x1xf32> to vector<32x16xf32>
    %38 = arith.subf %30, %37 : vector<32x16xf32>
    %39 = arith.mulf %38, %38 : vector<32x16xf32>
    %cst_16 = arith.constant dense<0.000000e+00> : vector<32xf32>
    %40 = vector.multi_reduction <add>, %39, %cst_16 [1] : vector<32x16xf32> to vector<32xf32>
    %41 = vector.shape_cast %40 : vector<32xf32> to vector<32x1xf32>
    %cst_17 = arith.constant 1.600000e+01 : f32
    %42 = vector.broadcast %cst_17 : f32 to vector<32x1xf32>
    %43 = arith.divf %41, %42 : vector<32x1xf32>
    %44 = vector.broadcast %36 : vector<32x1xf32> to vector<32x16xf32>
    %45 = arith.subf %30, %44 : vector<32x16xf32>
    %46 = vector.broadcast %31 : vector<1x16xf32> to vector<32x16xf32>
    %47 = arith.mulf %46, %45 : vector<32x16xf32>
    %cst_18 = arith.constant 9.99999974E-6 : f32
    %48 = vector.broadcast %cst_18 : f32 to vector<32x1xf32>
    %49 = arith.addf %43, %48 : vector<32x1xf32>
    %50 = math.rsqrt %49 : vector<32x1xf32>
    %51 = vector.broadcast %50 : vector<32x1xf32> to vector<32x16xf32>
    %52 = arith.mulf %47, %51 : vector<32x16xf32>
    %53 = vector.broadcast %32 : vector<1x16xf32> to vector<32x16xf32>
    %54 = arith.addf %52, %53 : vector<32x16xf32>
    %c0_19 = arith.constant 0 : index
    %c64 = arith.constant 64 : index
    %55 = vector.load %arg2[%c0_19, %c64] : memref<16x128xf32, #tpu.memory_space<vmem>>, vector<16x32xf32>
    %cst_20 = arith.constant dense<0.000000e+00> : vector<32x32xf32>
    %56 = tpu.matmul %54, %55, %cst_20 {dimension_numbers = #tpu.dot_dimension_numbers<[1], [0], [0], [1], [0, 0, 1, 1], [], []>} : vector<32x16xf32>, vector<16x32xf32>, vector<32x32xf32> -> vector<32x32xf32>
    %c2 = arith.constant 2 : index
    %c0_21 = arith.constant 0 : index
    %57 = vector.load %arg3[%c2, %c0_21] : memref<8x48xf32, #tpu.memory_space<vmem>>, vector<1x32xf32>
    %58 = vector.broadcast %57 : vector<1x32xf32> to vector<32x32xf32>
    %59 = arith.addf %56, %58 : vector<32x32xf32>
    %cst_22 = arith.constant 0.000000e+00 : f32
    %60 = vector.broadcast %cst_22 : f32 to vector<32x32xf32>
    %61 = arith.maximumf %59, %60 : vector<32x32xf32>
    %c0_23 = arith.constant 0 : index
    %c96 = arith.constant 96 : index
    %62 = vector.load %arg2[%c0_23, %c96] : memref<16x128xf32, #tpu.memory_space<vmem>>, vector<16x32xf32>
    %cst_24 = arith.constant dense<0.000000e+00> : vector<32x16xf32>
    %63 = tpu.matmul %61, %62, %cst_24 {dimension_numbers = #tpu.dot_dimension_numbers<[1], [1], [0], [0], [0, 0, 1, 0], [], []>} : vector<32x32xf32>, vector<16x32xf32>, vector<32x16xf32> -> vector<32x16xf32>
    %c3 = arith.constant 3 : index
    %c0_25 = arith.constant 0 : index
    %64 = vector.load %arg3[%c3, %c0_25] : memref<8x48xf32, #tpu.memory_space<vmem>>, vector<1x16xf32>
    %65 = vector.broadcast %64 : vector<1x16xf32> to vector<32x16xf32>
    %66 = arith.addf %63, %65 : vector<32x16xf32>
    %67 = arith.addf %54, %66 : vector<32x16xf32>
    %c6 = arith.constant 6 : index
    %c0_26 = arith.constant 0 : index
    %68 = vector.load %arg3[%c6, %c0_26] : memref<8x48xf32, #tpu.memory_space<vmem>>, vector<1x16xf32>
    %c7 = arith.constant 7 : index
    %c0_27 = arith.constant 0 : index
    %69 = vector.load %arg3[%c7, %c0_27] : memref<8x48xf32, #tpu.memory_space<vmem>>, vector<1x16xf32>
    %cst_28 = arith.constant dense<0.000000e+00> : vector<32xf32>
    %70 = vector.multi_reduction <add>, %67, %cst_28 [1] : vector<32x16xf32> to vector<32xf32>
    %71 = vector.shape_cast %70 : vector<32xf32> to vector<32x1xf32>
    %cst_29 = arith.constant 1.600000e+01 : f32
    %72 = vector.broadcast %cst_29 : f32 to vector<32x1xf32>
    %73 = arith.divf %71, %72 : vector<32x1xf32>
    %74 = vector.broadcast %73 : vector<32x1xf32> to vector<32x16xf32>
    %75 = arith.subf %67, %74 : vector<32x16xf32>
    %76 = arith.mulf %75, %75 : vector<32x16xf32>
    %cst_30 = arith.constant dense<0.000000e+00> : vector<32xf32>
    %77 = vector.multi_reduction <add>, %76, %cst_30 [1] : vector<32x16xf32> to vector<32xf32>
    %78 = vector.shape_cast %77 : vector<32xf32> to vector<32x1xf32>
    %cst_31 = arith.constant 1.600000e+01 : f32
    %79 = vector.broadcast %cst_31 : f32 to vector<32x1xf32>
    %80 = arith.divf %78, %79 : vector<32x1xf32>
    %81 = vector.broadcast %73 : vector<32x1xf32> to vector<32x16xf32>
    %82 = arith.subf %67, %81 : vector<32x16xf32>
    %83 = vector.broadcast %68 : vector<1x16xf32> to vector<32x16xf32>
    %84 = arith.mulf %83, %82 : vector<32x16xf32>
    %cst_32 = arith.constant 9.99999974E-6 : f32
    %85 = vector.broadcast %cst_32 : f32 to vector<32x1xf32>
    %86 = arith.addf %80, %85 : vector<32x1xf32>
    %87 = math.rsqrt %86 : vector<32x1xf32>
    %88 = vector.broadcast %87 : vector<32x1xf32> to vector<32x16xf32>
    %89 = arith.mulf %84, %88 : vector<32x16xf32>
    %90 = vector.broadcast %69 : vector<1x16xf32> to vector<32x16xf32>
    %91 = arith.addf %89, %90 : vector<32x16xf32>
    %92 = arith.negf %91 : vector<32x16xf32>
    %93 = math.exp %92 : vector<32x16xf32>
    %cst_33 = arith.constant 1.000000e+00 : f32
    %94 = vector.broadcast %cst_33 : f32 to vector<32x16xf32>
    %95 = arith.addf %94, %93 : vector<32x16xf32>
    %96 = arith.divf %94, %95 : vector<32x16xf32>
    %c0_34 = arith.constant 0 : index
    %c0_35 = arith.constant 0 : index
    %97 = vector.load %arg4[%c0_34, %c0_35] : memref<32x16xf32, #tpu.memory_space<vmem>>, vector<32x16xf32>
    tpu.vector_store %arg4[%c0_34, %c0_35], %96 {strides = array<i32>} : memref<32x16xf32, #tpu.memory_space<vmem>>, vector<32x16xf32>,
    return
  }
  func.func @transform_0(%arg0: i32) -> (i32, i32) {
    %c0_i32 = arith.constant 0 : i32
    %c0_i32_0 = arith.constant 0 : i32
    return %arg0, %c0_i32 : i32, i32
  }
  func.func @transform_1(%arg0: i32) -> (i32, i32) {
    %c0_i32 = arith.constant 0 : i32
    %c0_i32_0 = arith.constant 0 : i32
    %c0_i32_1 = arith.constant 0 : i32
    return %c0_i32, %c0_i32_0 : i32, i32
  }
  func.func @transform_2(%arg0: i32) -> (i32, i32) {
    %c0_i32 = arith.constant 0 : i32
    %c0_i32_0 = arith.constant 0 : i32
    %c0_i32_1 = arith.constant 0 : i32
    return %c0_i32, %c0_i32_0 : i32, i32
  }
  func.func @transform_3(%arg0: i32) -> (i32, i32) {
    %c0_i32 = arith.constant 0 : i32
    %c0_i32_0 = arith.constant 0 : i32
    return %arg0, %c0_i32 : i32, i32
  }
}

</mosaic_0001>

<bundles_post_ra>
// kernel: vit_object_detection_forward.2
= control target key start
LH: loop header
LB: loop body
LE: loop exit
PB: predicated region body
PF: predicated region fallthrough
CT: control target
= control target key end

     0   :  { %s1453_s18 = smov 0   ;;  %s1642_s0 = inlined_call_operand.vmem [shape: f32[32,96], index: 0, kind: input, shape index: {}]   ;;  %s1643_s1 = inlined_call_operand.vmem [shape: f32[96,32], index: 1, kind: input, shape index: {}]   ;;  %s1644_s2 = inlined_call_operand.vmem [shape: f32[3,32], index: 2, kind: input, shape index: {}]   ;;  %s1645_s3 = inlined_call_operand.vmem [shape: f32[32,160], index: 3, kind: input, shape index: {}]   ;;  %s1646_s4 = inlined_call_operand.vmem [shape: f32[8,96], index: 4, kind: input, shape index: {}]   ;;  %s1647_s5 = inlined_call_operand.vmem [shape: f32[32,32], index: 5, kind: output, shape index: {}]  }
   0x1 LB: > { %s1106_s19 = sadd.s32 4294967295, %s1417_s18   ;;  %p1110_p0 = scmp.ge.s32.totalorder %s1417_s18, 1  ;;  %s1417_s18 = sphi %s1453_s18, %s15_s18  }
   0x2   : > { %p188_p1 = scmp.lt.s32.totalorder %s1417_s18, 3 }
   0x4   : > { %p189_p2 = pnand %p1110_p0, %p188_p1 }
   0x5   : > { %v230_v0 = vld [vmem:[%s1643_s1] sm:$0xff] (!%p189_p2)  ;;  %v231_v1 = vld [vmem:[%s1643_s1 + $0x8] sm:$0xff] (!%p189_p2)  ;;  %v232_v2 = vld [vmem:[%s1643_s1 + $0x10] sm:$0xff] (!%p189_p2)  ;;  %s1111_s26 = sshll.u32 (!%p189_p2), %s1106_s19, 1  ;;  %vm247_vm0 = vcmask (!%p189_p2), 785408   ;;  %vm331_vm1 = vcmask (!%p189_p2), 261120  }
   0x6   : > { %192 = sbr.rel (%p189_p2) target bundleno = 2935 (0xb77), region = 40  ;;  %v1279_v3 = vpack.c.bf16 (!%p189_p2), %v231_v1, %v230_v0  ;;  %v233_v4 = vld [vmem:[%s1643_s1 + $0x18] sm:$0xff] (!%p189_p2)  ;;  %p217_p3 = scmp.lt.s32.totalorder (!%p189_p2), %s1111_s26, 3  ;;  %v234_v6 = vld [vmem:[%s1643_s1 + $0x20] sm:$0xff] (!%p189_p2)  ;;  %v235_v7 = vld [vmem:[%s1643_s1 + $0x28] sm:$0xff] (!%p189_p2)  ;;  %vm550_vm3 = vcmask (!%p189_p2), 130048  }
   0x7   : > { %v1283_v5 = vpack.c.bf16 (!%p189_p2), %v233_v4, %v232_v2  ;;  %v1287_v8 = vpack.c.bf16 (!%p189_p2), %v235_v7, %v234_v6  ;;  %v236_v9 = vld [vmem:[%s1643_s1 + $0x30] sm:$0xff] (!%p189_p2)  ;;  %v237_v10 = vld [vmem:[%s1643_s1 + $0x38] sm:$0xff] (!%p189_p2)  ;;  %v238_v13 = vld [vmem:[%s1643_s1 + $0x40] sm:$0xff] (!%p189_p2)  ;;  %s1419_s19 = smov (!%p189_p2), 96   ;;  %s1420_s20 = smov (!%p189_p2), 64  }
   0x8   : > { %1280 = vmatprep.subr.bf16.mxu0 (!%p189_p2), %v1279_v3  ;;  %v1291_v12 = vpack.c.bf16 (!%p189_p2), %v237_v10, %v236_v9  ;;  %v239_v14 = vld [vmem:[%s1643_s1 + $0x48] sm:$0xff] (!%p189_p2)  ;;  %v240_v16 = vld [vmem:[%s1643_s1 + $0x50] sm:$0xff] (!%p189_p2)  ;;  %v241_v17 = vld [vmem:[%s1643_s1 + $0x58] sm:$0xff] (!%p189_p2)  ;;  %s1421_s21 = smov (!%p189_p2), 32   ;;  %s1422_s9 = smov (!%p189_p2), 112  }
   0x9   : > { %1282 = vmatpush3.bf16.msra.mxu0 (!%p189_p2), %v1279_v3  ;;  %v1295_v15 = vpack.c.bf16 (!%p189_p2), %v239_v14, %v238_v13  ;;  %v1299_v18 = vpack.c.bf16 (!%p189_p2), %v241_v17, %v240_v16  ;;  %v1115_v20 = vld [vmem:[%s1644_s2] ss:$0 sm:$0xff] (!%p189_p2)  ;;  %v1522_v38 = vld [vmem:[%s1645_s3 + $0x10] sm:$0xff] (!%p189_p2)  ;;  %v1118_v49 = vld [vmem:[%s1644_s2 + $0x1] ss:$0 sm:$0xff] (!%p189_p2) }
   0xa   : > { %1284 = vmatprep.subr.bf16.mxu0 (!%p189_p2), %v1283_v5  ;;  %v1517_v37 = vld [vmem:[%s1645_s3] sm:$0xff] (!%p189_p2)  ;;  %v1534_v41 = vld [vmem:[%s1645_s3 + $0x30] sm:$0xff] (!%p189_p2)  ;;  %vm1312_vm2 = vmpackc.low (!%p189_p2), %vm331_vm1, %vm331_vm1 }
   0xb   : > { %v1527_v39 = vld [vmem:[%s1645_s3 + $0x20] sm:$0xff] (!%p189_p2)  ;;  %v1303_v40 = vpack.c.bf16 (!%p189_p2), %v1522_v38, %v1517_v37  ;;  %vm1597_vm4 = vmpackc.low (!%p189_p2), %vm550_vm3, %vm550_vm3 }
   0xc   : > { %v1307_v42 = vpack.c.bf16 (!%p189_p2), %v1534_v41, %v1527_v39  ;;  %v1119_v52 = vld [vmem:[%s1644_s2 + $0x2] ss:$0 sm:$0xff] (!%p189_p2)  ;;  %v1120_v59 = vld [vmem:[%s1646_s4] ss:$0 sm:$0xff] (!%p189_p2) }
   0xd   : > { %s1651_s26 = smov (!%p217_p3, %s1111_s26), 3  ;;  %1286 = vmatpush3.bf16.msra.mxu0 %v1283_v5 }
   0xe   : > { %s1112_s8 = sshll.u32 %s1651_s26, 3  ;;  %1288 = vmatprep.subr.bf16.mxu0 %v1287_v8 }
   0xf   : > { %s220_s15 = scalar_lea.vmem %s1642_s0, %s1112_s8  ;;  %s226_s25 = scalar_lea.vmem %s1647_s5, %s1112_s8 }
  0x10   : > { %v228_v11 = vld [vmem:[%s220_s15] sm:$0xff]  ;;  %v229_v19 = vld [vmem:[%s220_s15 + $0x8] sm:$0xff] }
  0x11   : > { %1218 = vmatprep.mubr.msk.f32.mxu0 %vm247_vm0, %v228_v11  ;;  %1290 = vmatpush3.bf16.msra.mxu0 %v1287_v8 }
  0x12   : > { %1292 = vmatprep.subr.bf16.mxu0 %v1291_v12 }
  0x15   : > { %1294 = vmatpush3.bf16.msra.mxu0 %v1291_v12 }
  0x16   : > { %1296 = vmatprep.subr.bf16.mxu0 %v1295_v15 }
  0x19   : > { %1298 = vmatpush3.bf16.msra.mxu0 %v1295_v15 }
  0x1a   : > { %1300 = vmatprep.subr.bf16.mxu0 %v1299_v18 }
  0x1d   : > { %1302 = vmatpush3.bf16.msra.mxu0 %v1299_v18 }
  0x1e   : > { %1304 = vmatprep.subr.bf16.mxu0 %v1303_v40 }
  0x20   : > { %1219 = vmatmul.mubr.msk.f32.vlgmr.msra.gmra.mrb[0].mxu0 %vm247_vm0, %v229_v19  ;;  %v1371_v19 = vpack.i.bf16 %v1522_v38, %v1517_v37 }
  0x21   : > { %1306 = vmatpush3.bf16.msra.mxu0 %v1303_v40 }
  0x22   : > { %1308 = vmatprep.subr.bf16.mxu0 %v1307_v42 }
  0x25   : > { %1310 = vmatpush3.bf16.msra.mxu0 %v1307_v42 }
  0xf3   : > { %v1220_v21 = vpop.f32.mrb[0].mxu0 }
  0xf4   : > { %v320_v22 = vpop.f32.mrb[1].mxu0  ;;  %v326_v24 = vadd.f32 %v1220_v21, %v1115_v20 }
  0xf5   : > { %v321_v23 = vadd.f32 %v1115_v20, %v320_v22  ;;  %v1376_v20 = vpack.i.bf16 %v1534_v41, %v1527_v39  ;;  %v1129_v41 = vld [vmem:[%s1646_s4 + $0x1] ss:$0 sm:$0xff] }
  0xf6   : > { %v335_v26 = vsel %vm331_vm1, %v326_v24, 0.0 }
  0xf7   : > { %v332_v25 = vsel %vm331_vm1, %v321_v23, 0.0 }
  0xf8   : > { %333 = vadd.xlane.f32.xlu0 %v332_v25 }
  0xfc   : > { %336 = vadd.xlane.f32.xlu0 %v335_v26 }
 0x185   : > { %v334_v27 = vpop.xlane.xlu0 %333 }
 0x186   : > { %v339_v28 = vmul.f32 0.03125, %v334_v27 }
 0x188   : > { %v341_v29 = vsub.f32 %v321_v23, %v339_v28 }
 0x189   : > { %v337_v30 = vpop.xlane.xlu0 %336 }
 0x18a   : > { %v340_v31 = vmul.f32 0.03125, %v337_v30  ;;  %v343_v32 = vmul.f32 %v341_v29, %v341_v29  ;;  %v357_v50 = vmul.f32 %v1118_v49, %v341_v29 }
 0x18c   : > { %v342_v33 = vsub.f32 %v326_v24, %v340_v31  ;;  %v345_v34 = vsel %vm331_vm1, %v343_v32, 0.0 }
 0x18d   : > { %346 = vadd.xlane.f32.xlu1 %v345_v34 }
 0x18e   : > { %v344_v35 = vmul.f32 %v342_v33, %v342_v33  ;;  %v358_v54 = vmul.f32 %v1118_v49, %v342_v33 }
 0x190   : > { %v348_v36 = vsel %vm331_vm1, %v344_v35, 0.0 }
 0x191   : > { %349 = vadd.xlane.f32.xlu1 %v348_v36 }
 0x21a   : > { %v347_v43 = vpop.xlane.xlu1 %346 }
 0x21b   : > { %v351_v44 = vmul.f32 0.03125, %v347_v43 }
 0x21d   : > { %v359_v45 = vadd.f32 1e-05, %v351_v44 }
 0x21e   : > { %v350_v46 = vpop.xlane.xlu1 %349 }
 0x21f   : > { %1391 = vrsqrt.f32 %v359_v45  ;;  %v352_v47 = vmul.f32 0.03125, %v350_v46 }
 0x221   : > { %v360_v48 = vadd.f32 1e-05, %v352_v47 }
 0x223   : > { %1393 = vrsqrt.f32 %v360_v48 }
 0x229   : > { %v1392_v51 = vpop.eup %1391 }
 0x22a   : > { %v363_v53 = vmul.f32 %v1392_v51, %v357_v50 }
 0x22c   : > { %v1544_v55 = vadd.f32 %v1119_v52, %v363_v53 }
 0x22d   : > { %v1394_v56 = vpop.eup %1393 }
 0x22e   : > { %v364_v57 = vmul.f32 %v1394_v56, %v358_v54  ;;  %1229 = vmatprep.mubr.msk.f32.mxu0 %vm331_vm1, %v1544_v55 }
 0x230   : > { %v1548_v58 = vadd.f32 %v1119_v52, %v364_v57 }
 0x232   : > { %1230 = vmatmul.mubr.msk.f32.vlgmr.msra.gmra.mrb[2].mxu0 %vm331_vm1, %v1548_v58 }
 0x305   : > { %v1231_v60 = vpop.f32.mrb[2].mxu0 }
 0x306   : > { %v458_v61 = vadd.f32 %v1231_v60, %v1120_v59  ;;  %v452_v62 = vpop.f32.mrb[3].mxu0 }
 0x307   : > { %v453_v63 = vadd.f32 %v1120_v59, %v452_v62  ;;  %v810_v62 = vld [vmem:[%s1645_s3 + $0x28] sm:$0xff] }
 0x309   : > { %1236 = vmatprep.mubr.msk.f32.mxu1 %vm331_vm1, %v453_v63  ;;  %v1361_v0 = vpack.i.bf16 %v458_v61, %v453_v63 }
 0x30b   : > { %1362 = vrot.lane.b32.xlu0 %v1361_v0, %s1419_s19 }
 0x30f   : > { %1372 = vrot.lane.b32.xlu0 %v1371_v19, %s1421_s21 }
 0x313   : > { %1377 = vrot.lane.b32.xlu0 %v1376_v20, %s1421_s21  ;;  %v1133_v20 = vld [vmem:[%s1646_s4 + $0x5] ss:$0 sm:$0xff] }
 0x37d   : > { %v1363_v1 = vpop.permute.xlu0 %1362 }
 0x37e   : > { %v1365_v2 = vunpack.i.h.bf16 %v1363_v1  ;;  %v1364_v3 = vunpack.i.l.bf16 %v1363_v1 }
 0x380   : > { %v1311_v4 = vpack.c.bf16 %v1365_v2, %v1364_v3 }
 0x381   : > { %v1373_v23 = vpop.permute.xlu0 %1372 }
 0x382   : > { %1313 = vmatprep.subr.msk.bf16.mxu1 %vm1312_vm2, %v1311_v4  ;;  %v1375_v25 = vunpack.i.h.bf16 %v1373_v23  ;;  %v1374_v26 = vunpack.i.l.bf16 %v1373_v23 }
 0x383   : > { %1316 = vmatpush3.bf16.xpose.msk.msra.mxu1 %vm1312_vm2, %v1311_v4 }
 0x384   : > { %v1321_v30 = vpack.c.bf16 %v1375_v25, %v1374_v26 }
 0x385   : > { %v1378_v31 = vpop.permute.xlu0 %1377 }
 0x386   : > { %v1380_v32 = vunpack.i.h.bf16 %v1378_v31  ;;  %v1379_v33 = vunpack.i.l.bf16 %v1378_v31 }
 0x388   : > { %v1325_v38 = vpack.c.bf16 %v1380_v32, %v1379_v33 }
 0x38a   : > { %1237 = vmatmul.mubr.msk.f32.vlgmr.msra.gmra.mrb[0].mxu1 %vm331_vm1, %v458_v61  ;;  %v809_v61 = vld [vmem:[%s1645_s3 + $0x18] sm:$0xff] }
 0x45d   : > { %v1238_v5 = vpop.f32.mrb[0].mxu1 }
 0x45e   : > { %v541_v6 = vpop.f32.mrb[1].mxu1  ;;  %v554_v8 = vsel %vm550_vm3, %v1238_v5, -inf }
 0x45f   : > { %v551_v7 = vsel %vm550_vm3, %v541_v6, -inf }
 0x460   : > { %552 = vmax.xlane.f32.xlu1 %v551_v7 }
 0x464   : > { %555 = vmax.xlane.f32.xlu1 %v554_v8 }
 0x4ed   : > { %v553_v9 = vpop.xlane.xlu1 %552 }
 0x4ee   : > { %v557_v10 = vsub.f32 %v541_v6, %v553_v9 }
 0x4f0   : > { %v559_v13 = vmul.f32 1.442695, %v557_v10  ;;  %v1132_v10 = vld [vmem:[%s1646_s4 + $0x4] ss:$0 sm:$0xff] }
 0x4f1   : > { %v556_v11 = vpop.xlane.xlu1 %555 }
 0x4f2   : > { %v558_v12 = vsub.f32 %v1238_v5, %v556_v11 }
 0x4f4   : > { %v561_v14 = vmul.f32 1.442695, %v558_v12 }
 0x4f6   : > { %1395 = vpow2.f32 %v561_v14 }
 0x4f7   : > { %1397 = vpow2.f32 %v559_v13 }
 0x500   : > { %v1396_v15 = vpop.eup %1395 }
 0x501   : > { %v566_v16 = vsel %vm550_vm3, %v1396_v15, 0.0  ;;  %v1398_v17 = vpop.eup %1397 }
 0x502   : > { %567 = vadd.xlane.f32.xlu1 %v566_v16  ;;  %v563_v18 = vsel %vm550_vm3, %v1398_v17, 0.0 }
 0x506   : > { %564 = vadd.xlane.f32.xlu1 %v563_v18 }
 0x517   : > { %1367 = vrot.lane.b32.xlu1 %v1361_v0, %s1420_s20  ;;  %v811_v0 = vld [vmem:[%s1645_s3 + $0x38] sm:$0xff] }
 0x518   : > { %v1333_v1 = vpack.c.bf16 %v811_v0, %v810_v62  ;;  %v1386_v3 = vpack.i.bf16 %v811_v0, %v810_v62 }
 0x58f   : > { %v568_v21 = vpop.xlane.xlu1 %567 }
 0x590   : > { %1399 = vrcp.f32 %v568_v21 }
 0x593   : > { %v565_v22 = vpop.xlane.xlu1 %564 }
 0x594   : > { %1401 = vrcp.f32 %v565_v22 }
 0x597   : > { %v1368_v24 = vpop.permute.xlu1 %1367 }
 0x598   : > { %v1370_v27 = vunpack.i.h.bf16 %v1368_v24  ;;  %v1369_v28 = vunpack.i.l.bf16 %v1368_v24 }
 0x59a   : > { %v1317_v29 = vpack.c.bf16 %v1370_v27, %v1369_v28  ;;  %v1400_v34 = vpop.eup %1399 }
 0x59b   : > { %v572_v37 = vmul.f32 %v1400_v34, %v1396_v15 }
 0x59c   : > { %1318 = vmatprep.subr.bf16.mxu1 %v1317_v29 }
 0x59d   : > { %1320 = vmatpush3.bf16.msra.mxu1 %v1317_v29  ;;  %v1134_v29 = vld [vmem:[%s1646_s4 + $0x2] ss:$0 sm:$0xff] }
 0x59e   : > { %v1402_v35 = vpop.eup %1401  ;;  %1322 = vmatprep.subr.bf16.mxu1 %v1321_v30 }
 0x59f   : > { %v571_v36 = vmul.f32 %v1402_v35, %v1398_v17 }
 0x5a1   : > { %1243 = vmatprep.mubr.msk.f32.mxu1 %vm550_vm3, %v571_v36  ;;  %v1137_v36 = vld [vmem:[%s1646_s4 + $0x3] ss:$0 sm:$0xff] }
 0x5a2   : > { %1244 = vmatmul.mubr.msk.f32.vlgmr.msra.gmra.mrb[2].mxu1 %vm550_vm3, %v572_v37 }
 0x5a3   : > { %1324 = vmatpush3.bf16.msra.mxu1 %v1321_v30 }
 0x5a4   : > { %1326 = vmatprep.subr.bf16.mxu1 %v1325_v38 }
 0x5a7   : > { %1328 = vmatpush3.bf16.msra.mxu1 %v1325_v38 }
 0x675   : > { %v1245_v39 = vpop.f32.mrb[2].mxu1 }
 0x676   : > { %v651_v40 = vpop.f32.mrb[3].mxu1 }
 0x677   : > { %1254 = vmatprep.mubr.msk.f32.mxu1 %vm331_vm1, %v651_v40 }
 0x678   : > { %1255 = vmatmul.mubr.msk.f32.vlgmr.msra.gmra.mrb[4].mxu1 %vm331_vm1, %v1245_v39 }
 0x74b   : > { %v1256_v42 = vpop.f32.mrb[4].mxu1 }
 0x74c   : > { %v763_v43 = vadd.f32 %v1256_v42, %v1129_v41  ;;  %v757_v44 = vpop.f32.mrb[5].mxu1 }
 0x74d   : > { %v758_v45 = vadd.f32 %v1129_v41, %v757_v44 }
 0x74e   : > { %v767_v46 = vadd.f32 %v763_v43, %v1548_v58 }
 0x74f   : > { %v766_v47 = vadd.f32 %v758_v45, %v1544_v55  ;;  %v808_v55 = vld [vmem:[%s1645_s3 + $0x8] sm:$0xff] }
 0x750   : > { %v773_v48 = vsel %vm331_vm1, %v767_v46, 0.0  ;;  %v1329_v63 = vpack.c.bf16 %v809_v61, %v808_v55  ;;  %v1381_v2 = vpack.i.bf16 %v809_v61, %v808_v55  ;;  %v1144_v61 = vld [vmem:[%s1646_s4 + $0x6] ss:$0 sm:$0xff] }
 0x751   : > { %774 = vadd.xlane.f32.xlu1 %v773_v48  ;;  %v770_v49 = vsel %vm331_vm1, %v766_v47, 0.0 }
 0x752   : > { %771 = vadd.xlane.f32.xlu0 %v770_v49  ;;  %1330 = vmatprep.subr.bf16.mxu0 %v1329_v63 }
 0x753   : > { %1332 = vmatpush3.bf16.msra.mxu0 %v1329_v63 }
 0x754   : > { %1334 = vmatprep.subr.bf16.mxu0 %v1333_v1 }
 0x757   : > { %1336 = vmatpush3.bf16.msra.mxu0 %v1333_v1 }
 0x762   : > { %1387 = vrot.lane.b32.xlu1 %v1386_v3, %s1422_s9 }
 0x7de   : > { %v775_v50 = vpop.xlane.xlu1 %774 }
 0x7df   : > { %v777_v51 = vmul.f32 0.03125, %v775_v50  ;;  %v772_v52 = vpop.xlane.xlu0 %771 }
 0x7e0   : > { %v776_v53 = vmul.f32 0.03125, %v772_v52 }
 0x7e1   : > { %v779_v54 = vsub.f32 %v767_v46, %v777_v51 }
 0x7e2   : > { %v778_v56 = vsub.f32 %v766_v47, %v776_v53  ;;  %v1388_v12 = vpop.permute.xlu1 %1387 }
 0x7e3   : > { %v781_v60 = vmul.f32 %v779_v54, %v779_v54  ;;  %v1390_v15 = vunpack.i.h.bf16 %v1388_v12  ;;  %v1389_v16 = vunpack.i.l.bf16 %v1388_v12  ;;  %v795_v24 = vmul.f32 %v1132_v10, %v779_v54 }
 0x7e4   : > { %v780_v57 = vmul.f32 %v778_v56, %v778_v56  ;;  %v794_v17 = vmul.f32 %v1132_v10, %v778_v56 }
 0x7e5   : > { %v785_v58 = vsel %vm331_vm1, %v781_v60, 0.0  ;;  %v1343_v22 = vpack.c.bf16 %v1390_v15, %v1389_v16 }
 0x7e6   : > { %v782_v59 = vsel %vm331_vm1, %v780_v57, 0.0 }
 0x7e7   : > { %783 = vadd.xlane.f32.xlu0 %v782_v59 }
 0x7eb   : > { %786 = vadd.xlane.f32.xlu0 %v785_v58 }
 0x801   : > { %1382 = vrot.lane.b32.xlu0 %v1381_v2, %s1422_s9  ;;  %v1145_v2 = vld [vmem:[%s1646_s4 + $0x7] ss:$0 sm:$0xff] }
 0x874   : > { %v784_v4 = vpop.xlane.xlu0 %783 }
 0x875   : > { %v788_v5 = vmul.f32 0.03125, %v784_v4 }
 0x877   : > { %v796_v6 = vadd.f32 1e-05, %v788_v5 }
 0x878   : > { %v787_v7 = vpop.xlane.xlu0 %786 }
 0x879   : > { %1403 = vrsqrt.f32 %v796_v6  ;;  %v789_v8 = vmul.f32 0.03125, %v787_v7 }
 0x87b   : > { %v797_v9 = vadd.f32 1e-05, %v789_v8 }
 0x87c   : > { %v1383_v11 = vpop.permute.xlu0 %1382 }
 0x87d   : > { %1405 = vrsqrt.f32 %v797_v9  ;;  %v1385_v13 = vunpack.i.h.bf16 %v1383_v11  ;;  %v1384_v14 = vunpack.i.l.bf16 %v1383_v11 }
 0x87f   : > { %v1337_v21 = vpack.c.bf16 %v1385_v13, %v1384_v14 }
 0x881   : > { %1339 = vmatprep.subr.msk.bf16.mxu1 %vm1597_vm4, %v1337_v21 }
 0x882   : > { %1342 = vmatpush3.bf16.xpose.msk.msra.mxu1 %vm1597_vm4, %v1337_v21 }
 0x883   : > { %v1404_v19 = vpop.eup %1403  ;;  %1345 = vmatprep.subr.msk.bf16.mxu1 %vm1597_vm4, %v1343_v22 }
 0x884   : > { %v800_v23 = vmul.f32 %v1404_v19, %v794_v17 }
 0x886   : > { %v806_v25 = vadd.f32 %v1133_v20, %v800_v23 }
 0x887   : > { %v1406_v26 = vpop.eup %1405 }
 0x888   : > { %v801_v27 = vmul.f32 %v1406_v26, %v795_v24  ;;  %1265 = vmatprep.mubr.msk.f32.mxu0 %vm331_vm1, %v806_v25 }
 0x88a   : > { %v807_v28 = vadd.f32 %v1133_v20, %v801_v27  ;;  %1348 = vmatpush3.bf16.xpose.msk.msra.mxu1 %vm1597_vm4, %v1343_v22 }
 0x88c   : > { %1266 = vmatmul.mubr.msk.f32.vlgmr.msra.gmra.mrb[4].mxu0 %vm331_vm1, %v807_v28 }
 0x95f   : > { %v1267_v30 = vpop.f32.mrb[4].mxu0 }
 0x960   : > { %v895_v31 = vadd.f32 %v1267_v30, %v1134_v29  ;;  %v889_v32 = vpop.f32.mrb[5].mxu0 }
 0x961   : > { %v890_v33 = vadd.f32 %v1134_v29, %v889_v32 }
 0x962   : > { %v899_v35 = vmax.f32 %v895_v31, 0.0 }
 0x963   : > { %v898_v34 = vmax.f32 %v890_v33, 0.0 }
 0x965   : > { %1276 = vmatprep.mubr.msk.f32.mxu1 %vm550_vm3, %v898_v34 }
 0x966   : > { %1277 = vmatmul.mubr.msk.f32.vlgmr.msra.gmra.mrb[6].mxu1 %vm550_vm3, %v899_v35 }
 0xa39   : > { %v1278_v37 = vpop.f32.mrb[6].mxu1 }
 0xa3a   : > { %v1003_v38 = vadd.f32 %v1278_v37, %v1137_v36  ;;  %v997_v39 = vpop.f32.mrb[7].mxu1 }
 0xa3b   : > { %v998_v40 = vadd.f32 %v1137_v36, %v997_v39 }
 0xa3c   : > { %v1007_v41 = vadd.f32 %v1003_v38, %v807_v28 }
 0xa3d   : > { %v1006_v42 = vadd.f32 %v998_v40, %v806_v25 }
 0xa3e   : > { %v1013_v43 = vsel %vm331_vm1, %v1007_v41, 0.0 }
 0xa3f   : > { %1014 = vadd.xlane.f32.xlu0 %v1013_v43  ;;  %v1010_v44 = vsel %vm331_vm1, %v1006_v42, 0.0 }
 0xa40   : > { %1011 = vadd.xlane.f32.xlu1 %v1010_v44 }
 0xacc   : > { %v1015_v45 = vpop.xlane.xlu0 %1014 }
 0xacd   : > { %v1017_v46 = vmul.f32 0.03125, %v1015_v45  ;;  %v1012_v47 = vpop.xlane.xlu1 %1011 }
 0xace   : > { %v1016_v48 = vmul.f32 0.03125, %v1012_v47 }
 0xacf   : > { %v1019_v49 = vsub.f32 %v1007_v41, %v1017_v46 }
 0xad0   : > { %v1018_v50 = vsub.f32 %v1006_v42, %v1016_v48 }
 0xad1   : > { %v1021_v51 = vmul.f32 %v1019_v49, %v1019_v49  ;;  %v1035_v62 = vmul.f32 %v1144_v61, %v1019_v49 }
 0xad2   : > { %v1020_v52 = vmul.f32 %v1018_v50, %v1018_v50  ;;  %v1034_v0 = vmul.f32 %v1144_v61, %v1018_v50 }
 0xad3   : > { %v1025_v53 = vsel %vm331_vm1, %v1021_v51, 0.0 }
 0xad4   : > { %1026 = vadd.xlane.f32.xlu1 %v1025_v53  ;;  %v1022_v54 = vsel %vm331_vm1, %v1020_v52, 0.0 }
 0xad5   : > { %1023 = vadd.xlane.f32.xlu0 %v1022_v54 }
 0xb61   : > { %v1027_v56 = vpop.xlane.xlu1 %1026 }
 0xb62   : > { %v1029_v57 = vmul.f32 0.03125, %v1027_v56  ;;  %v1024_v59 = vpop.xlane.xlu0 %1023 }
 0xb63   : > { %v1028_v60 = vmul.f32 0.03125, %v1024_v59 }
 0xb64   : > { %v1037_v58 = vadd.f32 1e-05, %v1029_v57 }
 0xb65   : > { %v1036_v55 = vadd.f32 1e-05, %v1028_v60 }
 0xb66   : > { %1407 = vrsqrt.f32 %v1037_v58 }
 0xb67   : > { %1409 = vrsqrt.f32 %v1036_v55 }
 0xb70   : > { %v1408_v63 = vpop.eup %1407 }
 0xb71   : > { %v1410_v1 = vpop.eup %1409  ;;  %v1041_v3 = vmul.f32 %v1408_v63, %v1035_v62 }
 0xb72   : > { %v1040_v4 = vmul.f32 %v1410_v1, %v1034_v0 }
 0xb73   : > { %v1047_v6 = vadd.f32 %v1145_v2, %v1041_v3 }
 0xb74   : > { %v1046_v5 = vadd.f32 %v1145_v2, %v1040_v4 }
 0xb75   : > { %1049 = vst.msk [vmem:[%s226_s25 + $0x8] sm:$0xff] %vm331_vm1, %v1047_v6 }
 0xb76   : > { %1048 = vst.msk [vmem:[%s226_s25] sm:$0xff] %vm331_vm1, %v1046_v5 }
 0xb77 PF: > { %s15_s18 = sadd.s32 1, %s1417_s18  }
 0xb78   : > { %p12_p4 = scmp.ge.s32.totalorder %s15_s18, 4  }
 0xb7a   :  { %14 = sbr.rel (!%p12_p4) target bundleno = 1 (0x1), region = 70 }

// kernel: vit_object_detection_forward.3
= control target key start
LH: loop header
LB: loop body
LE: loop exit
PB: predicated region body
PF: predicated region fallthrough
CT: control target
= control target key end

     0   :  { %s1445_s12 = smov 0   ;;  %s1588_s0 = inlined_call_operand.vmem [shape: f32[64,16], index: 0, kind: input, shape index: {}]   ;;  %s1589_s1 = inlined_call_operand.vmem [shape: f32[16,128], index: 1, kind: input, shape index: {}]   ;;  %s1590_s2 = inlined_call_operand.vmem [shape: f32[8,48], index: 2, kind: input, shape index: {}]   ;;  %s1591_s3 = inlined_call_operand.vmem [shape: f32[64,16], index: 3, kind: output, shape index: {}]  }
   0x1 LB: > { %s1117_s13 = sadd.s32 4294967295, %s1418_s12   ;;  %p1121_p0 = scmp.ge.s32.totalorder %s1418_s12, 1  ;;  %s1418_s12 = sphi %s1445_s12, %s13_s12  }
   0x2   : > { %p138_p1 = scmp.lt.s32.totalorder %s1418_s12, 3 }
   0x4   : > { %p139_p2 = pnand %p1121_p0, %p138_p1 }
   0x5   : > { %v1456_v0 = vld [vmem:[%s1589_s1] sm:$0xff] (!%p139_p2)  ;;  %v1461_v1 = vld [vmem:[%s1589_s1 + $0x8] sm:$0xff] (!%p139_p2)  ;;  %s1122_s18 = sshll.u32 (!%p139_p2), %s1117_s13, 2  ;;  %vm185_vm0 = vcmask (!%p139_p2), 130048   ;;  %s1420_s25 = smov (!%p139_p2), 112   ;;  %vm396_vm2 = vcmask (!%p139_p2), 261120  }
   0x6   : > { %142 = sbr.rel (%p139_p2) target bundleno = 2440 (0x988), region = 32  ;;  %v1278_v2 = vpack.c.bf16 (!%p139_p2), %v1461_v1, %v1456_v0  ;;  %p163_p3 = scmp.lt.s32.totalorder (!%p139_p2), %s1122_s18, 7  ;;  %v1126_v7 = vld [vmem:[%s1590_s2] ss:$0 sm:$0xff] (!%p139_p2)  ;;  %vm1283_vm1 = vmpackc.low (!%p139_p2), %vm185_vm0, %vm185_vm0  ;;  %v1512_v54 = vpack.i.bf16 (!%p139_p2), %v1461_v1, %v1456_v0 }
   0x7   : > { %s1421_s26 = smov (!%p139_p2), 96   ;;  %s1422_s27 = smov (!%p139_p2), 80   ;;  %vm1311_vm3 = vmpackc.low (!%p139_p2), %vm396_vm2, %vm396_vm2 }
   0x8   : > { %1279 = vmatprep.subr.bf16.mxu0 (!%p139_p2), %v1278_v2  ;;  %s1423_s30 = smov (!%p139_p2), 64   ;;  %s1424_s4 = smov (!%p139_p2), 32  }
   0x9   : > { %1281 = vmatpush3.bf16.msra.mxu0 (!%p139_p2), %v1278_v2 }
   0xd   : > { %s1593_s18 = smov (!%p163_p3, %s1122_s18), 7 }
   0xe   : > { %s1123_s19 = sshll.u32 %s1593_s18, 3 }
   0xf   : > { %s166_s22 = scalar_lea.vmem %s1588_s0, %s1123_s19 }
  0x10   : > { %v1473_v3 = vld [vmem:[%s166_s22] sm:$0xff]  ;;  %v1475_v4 = vld [vmem:[%s166_s22 + $0x8] sm:$0xff]  ;;  %v1477_v5 = vld [vmem:[%s166_s22 + $0x10] sm:$0xff] }
  0x11   : > { %1214 = vmatprep.mubr.msk.f32.mxu0 %vm185_vm0, %v1473_v3  ;;  %v1485_v6 = vld [vmem:[%s166_s22 + $0x18] sm:$0xff]  ;;  %s172_s22 = scalar_lea.vmem %s1591_s3, %s1123_s19 }
  0x12   : > { %1215 = vmatmul.mubr.msk.f32.vlgmr.msra.gmra.mrb[0].mxu0 %vm185_vm0, %v1475_v4 }
  0x13   : > { %1217 = vmatprep.mubr.msk.f32.mxu0 %vm185_vm0, %v1477_v5 }
  0x16   : > { %1218 = vmatmul.mubr.msk.f32.gmra.mrb[2].mxu0 %vm185_vm0, %v1485_v6 }
  0xe5   : > { %v1216_v8 = vpop.f32.mrb[0].mxu0 }
  0xe6   : > { %v270_v9 = vadd.f32 %v1216_v8, %v1126_v7  ;;  %v264_v10 = vpop.f32.mrb[1].mxu0 }
  0xe7   : > { %v265_v11 = vadd.f32 %v1126_v7, %v264_v10 }
  0xe9   : > { %1228 = vmatprep.mubr.msk.f32.mxu1 %vm185_vm0, %v265_v11  ;;  %v1493_v12 = vpack.i.bf16 %v270_v9, %v265_v11  ;;  %v1219_v13 = vpop.f32.mrb[2].mxu0 }
  0xea   : > { %v280_v14 = vadd.f32 %v1219_v13, %v1126_v7  ;;  %v274_v15 = vpop.f32.mrb[3].mxu0 }
  0xeb   : > { %1330 = vrot.lane.b32.xlu0 %v1493_v12, %s1420_s25  ;;  %v275_v16 = vadd.f32 %v1126_v7, %v274_v15 }
  0xed   : > { %v1334_v17 = vpack.i.bf16 %v280_v14, %v275_v16 }
  0xef   : > { %1335 = vrot.lane.b32.xlu0 %v1334_v17, %s1420_s25 }
 0x15d   : > { %v1331_v18 = vpop.permute.xlu0 %1330 }
 0x15e   : > { %v1333_v19 = vunpack.i.h.bf16 %v1331_v18  ;;  %v1332_v20 = vunpack.i.l.bf16 %v1331_v18 }
 0x160   : > { %v1282_v21 = vpack.c.bf16 %v1333_v19, %v1332_v20 }
 0x161   : > { %v1336_v22 = vpop.permute.xlu0 %1335 }
 0x162   : > { %1284 = vmatprep.subr.msk.bf16.mxu1 %vm1283_vm1, %v1282_v21  ;;  %v1338_v23 = vunpack.i.h.bf16 %v1336_v22  ;;  %v1337_v24 = vunpack.i.l.bf16 %v1336_v22 }
 0x163   : > { %1287 = vmatpush3.bf16.xpose.msk.msra.mxu1 %vm1283_vm1, %v1282_v21 }
 0x164   : > { %v1288_v25 = vpack.c.bf16 %v1338_v23, %v1337_v24  ;;  %v1143_v23 = vld [vmem:[%s1590_s2 + $0x1] ss:$0 sm:$0xff] }
 0x166   : > { %1290 = vmatprep.subr.msk.bf16.mxu1 %vm1283_vm1, %v1288_v25 }
 0x16b   : > { %1293 = vmatpush3.bf16.xpose.msk.msra.mxu1 %vm1283_vm1, %v1288_v25 }
 0x172   : > { %1229 = vmatmul.mubr.msk.f32.vlgmr.msra.gmra.mrb[0].mxu1 %vm185_vm0, %v270_v9 }
 0x173   : > { %1231 = vmatprep.mubr.msk.f32.mxu1 %vm185_vm0, %v275_v16 }
 0x176   : > { %1232 = vmatmul.mubr.msk.f32.gmra.mrb[2].mxu1 %vm185_vm0, %v280_v14 }
 0x245   : > { %v1230_v26 = vpop.f32.mrb[0].mxu1 }
 0x246   : > { %v377_v27 = vpop.f32.mrb[1].mxu1  ;;  %v400_v31 = vsel %vm396_vm2, %v1230_v26, -inf }
 0x247   : > { %v397_v28 = vsel %vm396_vm2, %v377_v27, -inf }
 0x248   : > { %398 = vmax.xlane.f32.xlu1 %v397_v28 }
 0x249   : > { %v1233_v29 = vpop.f32.mrb[2].mxu1 }
 0x24a   : > { %v387_v30 = vpop.f32.mrb[3].mxu1  ;;  %v406_v33 = vsel %vm396_vm2, %v1233_v29, -inf }
 0x24b   : > { %v403_v32 = vsel %vm396_vm2, %v387_v30, -inf }
 0x24c   : > { %401 = vmax.xlane.f32.xlu1 %v400_v31  ;;  %404 = vmax.xlane.f32.xlu0 %v403_v32 }
 0x250   : > { %407 = vmax.xlane.f32.xlu1 %v406_v33 }
 0x262   : > { %1345 = vrot.lane.b32.xlu0 %v1334_v17, %s1421_s26 }
 0x2d5   : > { %v399_v34 = vpop.xlane.xlu1 %398 }
 0x2d6   : > { %v409_v35 = vsub.f32 %v377_v27, %v399_v34 }
 0x2d8   : > { %v413_v38 = vmul.f32 1.442695, %v409_v35 }
 0x2d9   : > { %v402_v36 = vpop.xlane.xlu1 %401  ;;  %v405_v40 = vpop.xlane.xlu0 %404 }
 0x2da   : > { %v410_v37 = vsub.f32 %v1230_v26, %v402_v36  ;;  %v411_v43 = vsub.f32 %v387_v30, %v405_v40 }
 0x2dc   : > { %v415_v39 = vmul.f32 1.442695, %v410_v37  ;;  %v417_v45 = vmul.f32 1.442695, %v411_v43 }
 0x2dd   : > { %v408_v41 = vpop.xlane.xlu1 %407  ;;  %v1346_v59 = vpop.permute.xlu0 %1345 }
 0x2de   : > { %1364 = vpow2.f32 %v415_v39  ;;  %v412_v42 = vsub.f32 %v1233_v29, %v408_v41  ;;  %v1348_v63 = vunpack.i.h.bf16 %v1346_v59  ;;  %v1347_v2 = vunpack.i.l.bf16 %v1346_v59 }
 0x2df   : > { %1366 = vpow2.f32 %v413_v38 }
 0x2e0   : > { %v419_v44 = vmul.f32 1.442695, %v412_v42  ;;  %v1298_v1 = vpack.c.bf16 %v1348_v63, %v1347_v2 }
 0x2e2   : > { %1368 = vpow2.f32 %v419_v44 }
 0x2e3   : > { %1370 = vpow2.f32 %v417_v45 }
 0x2e8   : > { %v1365_v46 = vpop.eup %1364 }
 0x2e9   : > { %v424_v47 = vsel %vm396_vm2, %v1365_v46, 0.0  ;;  %v1367_v48 = vpop.eup %1366 }
 0x2ea   : > { %425 = vadd.xlane.f32.xlu1 %v424_v47  ;;  %v421_v49 = vsel %vm396_vm2, %v1367_v48, 0.0 }
 0x2ec   : > { %v1369_v50 = vpop.eup %1368 }
 0x2ed   : > { %v430_v51 = vsel %vm396_vm2, %v1369_v50, 0.0  ;;  %v1371_v52 = vpop.eup %1370 }
 0x2ee   : > { %422 = vadd.xlane.f32.xlu1 %v421_v49  ;;  %v427_v53 = vsel %vm396_vm2, %v1371_v52, 0.0 }
 0x2f2   : > { %431 = vadd.xlane.f32.xlu1 %v430_v51 }
 0x2f6   : > { %428 = vadd.xlane.f32.xlu1 %v427_v53 }
 0x307   : > { %1340 = vrot.lane.b32.xlu1 %v1493_v12, %s1421_s26 }
 0x30b   : > { %1350 = vrot.lane.b32.xlu1 %v1512_v54, %s1422_s27 }
 0x377   : > { %v426_v55 = vpop.xlane.xlu1 %425 }
 0x37b   : > { %v423_v56 = vpop.xlane.xlu1 %422 }
 0x37c   : > { %1372 = vrcp.f32 %v423_v56 }
 0x37d   : > { %1374 = vrcp.f32 %v426_v55 }
 0x37f   : > { %v432_v57 = vpop.xlane.xlu1 %431 }
 0x383   : > { %v429_v58 = vpop.xlane.xlu1 %428 }
 0x384   : > { %1376 = vrcp.f32 %v429_v58 }
 0x385   : > { %1378 = vrcp.f32 %v432_v57 }
 0x386   : > { %v1373_v60 = vpop.eup %1372 }
 0x387   : > { %v1341_v61 = vpop.permute.xlu1 %1340  ;;  %v437_v62 = vmul.f32 %v1373_v60, %v1367_v48  ;;  %v1375_v12 = vpop.eup %1374 }
 0x388   : > { %v1343_v7 = vunpack.i.h.bf16 %v1341_v61  ;;  %v1342_v8 = vunpack.i.l.bf16 %v1341_v61  ;;  %v438_v15 = vmul.f32 %v1375_v12, %v1365_v46 }
 0x389   : > { %1242 = vmatprep.mubr.msk.f32.mxu0 %vm396_vm2, %v437_v62 }
 0x38a   : > { %v1294_v0 = vpack.c.bf16 %v1343_v7, %v1342_v8 }
 0x38b   : > { %v1351_v9 = vpop.permute.xlu1 %1350 }
 0x38c   : > { %1295 = vmatprep.subr.bf16.mxu0 %v1294_v0  ;;  %v1353_v10 = vunpack.i.h.bf16 %v1351_v9  ;;  %v1352_v11 = vunpack.i.l.bf16 %v1351_v9 }
 0x38d   : > { %1297 = vmatpush3.bf16.msra.mxu0 %v1294_v0 }
 0x38e   : > { %1299 = vmatprep.subr.bf16.mxu0 %v1298_v1  ;;  %v1302_v13 = vpack.c.bf16 %v1353_v10, %v1352_v11  ;;  %v1377_v14 = vpop.eup %1376 }
 0x38f   : > { %v1379_v16 = vpop.eup %1378  ;;  %v439_v17 = vmul.f32 %v1377_v14, %v1371_v52 }
 0x390   : > { %v440_v18 = vmul.f32 %v1379_v16, %v1369_v50 }
 0x391   : > { %1301 = vmatpush3.bf16.msra.mxu0 %v1298_v1 }
 0x392   : > { %1303 = vmatprep.subr.bf16.mxu0 %v1302_v13 }
 0x394   : > { %1243 = vmatmul.mubr.msk.f32.vlgmr.msra.gmra.mrb[4].mxu0 %vm396_vm2, %v438_v15 }
 0x395   : > { %1245 = vmatprep.mubr.msk.f32.mxu0 %vm396_vm2, %v439_v17  ;;  %1305 = vmatpush3.bf16.msra.mxu0 %v1302_v13 }
 0x398   : > { %1246 = vmatmul.mubr.msk.f32.gmra.mrb[6].mxu0 %vm396_vm2, %v440_v18  ;;  %v1149_v18 = vld [vmem:[%s1590_s2 + $0x5] ss:$0 sm:$0xff] }
 0x467   : > { %v1244_v19 = vpop.f32.mrb[4].mxu0 }
 0x468   : > { %v531_v20 = vpop.f32.mrb[5].mxu0 }
 0x469   : > { %1252 = vmatprep.mubr.msk.f32.mxu0 %vm185_vm0, %v531_v20 }
 0x46a   : > { %1253 = vmatmul.mubr.msk.f32.vlgmr.msra.gmra.mrb[8].mxu0 %vm185_vm0, %v1244_v19 }
 0x46b   : > { %v1247_v21 = vpop.f32.mrb[6].mxu0 }
 0x46c   : > { %v541_v22 = vpop.f32.mrb[7].mxu0 }
 0x46d   : > { %1255 = vmatprep.mubr.msk.f32.mxu0 %vm185_vm0, %v541_v22 }
 0x46e   : > { %1256 = vmatmul.mubr.msk.f32.gmra.mrb[10].mxu0 %vm185_vm0, %v1247_v21 }
 0x53d   : > { %v1254_v24 = vpop.f32.mrb[8].mxu0 }
 0x53e   : > { %v649_v25 = vadd.f32 %v1254_v24, %v1143_v23  ;;  %v643_v26 = vpop.f32.mrb[9].mxu0 }
 0x53f   : > { %v644_v27 = vadd.f32 %v1143_v23, %v643_v26 }
 0x540   : > { %v663_v28 = vadd.f32 %v649_v25, %v1475_v4 }
 0x541   : > { %v1257_v29 = vpop.f32.mrb[10].mxu0  ;;  %v662_v30 = vadd.f32 %v644_v27, %v1473_v3 }
 0x542   : > { %v653_v31 = vpop.f32.mrb[11].mxu0  ;;  %v671_v32 = vsel %vm185_vm0, %v663_v28, 0.0  ;;  %v659_v33 = vadd.f32 %v1257_v29, %v1143_v23 }
 0x543   : > { %v654_v34 = vadd.f32 %v1143_v23, %v653_v31  ;;  %672 = vadd.xlane.f32.xlu0 %v671_v32  ;;  %v668_v35 = vsel %vm185_vm0, %v662_v30, 0.0 }
 0x544   : > { %669 = vadd.xlane.f32.xlu1 %v668_v35  ;;  %v665_v38 = vadd.f32 %v659_v33, %v1485_v6 }
 0x545   : > { %v664_v36 = vadd.f32 %v654_v34, %v1477_v5  ;;  %v1150_v34 = vld [vmem:[%s1590_s2 + $0x2] ss:$0 sm:$0xff] }
 0x546   : > { %v677_v4 = vsel %vm185_vm0, %v665_v38, 0.0 }
 0x547   : > { %v674_v37 = vsel %vm185_vm0, %v664_v36, 0.0 }
 0x548   : > { %675 = vadd.xlane.f32.xlu1 %v674_v37 }
 0x54c   : > { %678 = vadd.xlane.f32.xlu1 %v677_v4 }
 0x5d0   : > { %v673_v3 = vpop.xlane.xlu0 %672 }
 0x5d1   : > { %v682_v39 = vmul.f32 0.0625, %v673_v3  ;;  %v670_v40 = vpop.xlane.xlu1 %669 }
 0x5d2   : > { %v681_v41 = vmul.f32 0.0625, %v670_v40 }
 0x5d3   : > { %v686_v42 = vsub.f32 %v663_v28, %v682_v39 }
 0x5d4   : > { %v685_v43 = vsub.f32 %v662_v30, %v681_v41 }
 0x5d5   : > { %v676_v44 = vpop.xlane.xlu1 %675  ;;  %v690_v45 = vmul.f32 %v686_v42, %v686_v42 }
 0x5d6   : > { %v683_v46 = vmul.f32 0.0625, %v676_v44  ;;  %v689_v47 = vmul.f32 %v685_v43, %v685_v43 }
 0x5d7   : > { %v696_v5 = vsel %vm185_vm0, %v690_v45, 0.0  ;;  %v1155_v45 = vld [vmem:[%s1590_s2 + $0x3] ss:$0 sm:$0xff] }
 0x5d8   : > { %v687_v48 = vsub.f32 %v664_v36, %v683_v46  ;;  %697 = vadd.xlane.f32.xlu1 %v696_v5  ;;  %v693_v6 = vsel %vm185_vm0, %v689_v47, 0.0 }
 0x5d9   : > { %694 = vadd.xlane.f32.xlu0 %v693_v6  ;;  %v679_v49 = vpop.xlane.xlu1 %678 }
 0x5da   : > { %v684_v50 = vmul.f32 0.0625, %v679_v49  ;;  %v691_v51 = vmul.f32 %v687_v48, %v687_v48 }
 0x5dc   : > { %v688_v52 = vsub.f32 %v665_v38, %v684_v50  ;;  %v699_v53 = vsel %vm185_vm0, %v691_v51, 0.0 }
 0x5dd   : > { %700 = vadd.xlane.f32.xlu0 %v699_v53 }
 0x5de   : > { %v692_v55 = vmul.f32 %v688_v52, %v688_v52 }
 0x5e0   : > { %v702_v56 = vsel %vm185_vm0, %v692_v55, 0.0 }
 0x5e1   : > { %703 = vadd.xlane.f32.xlu1 %v702_v56 }
 0x5f2   : > { %1360 = vrot.lane.b32.xlu1 %v1512_v54, %s1424_s4 }
 0x5f3   : > { %1355 = vrot.lane.b32.xlu0 %v1512_v54, %s1423_s30  ;;  %v1148_v54 = vld [vmem:[%s1590_s2 + $0x4] ss:$0 sm:$0xff] }
 0x5f4   : > { %v714_v13 = vmul.f32 %v1148_v54, %v686_v42  ;;  %v713_v15 = vmul.f32 %v1148_v54, %v685_v43  ;;  %v715_v23 = vmul.f32 %v1148_v54, %v687_v48  ;;  %v716_v29 = vmul.f32 %v1148_v54, %v688_v52 }
 0x665   : > { %v698_v57 = vpop.xlane.xlu1 %697 }
 0x666   : > { %v706_v58 = vmul.f32 0.0625, %v698_v57  ;;  %v695_v59 = vpop.xlane.xlu0 %694 }
 0x667   : > { %v705_v60 = vmul.f32 0.0625, %v695_v59 }
 0x668   : > { %v718_v61 = vadd.f32 1e-05, %v706_v58 }
 0x669   : > { %v717_v62 = vadd.f32 1e-05, %v705_v60 }
 0x66a   : > { %1380 = vrsqrt.f32 %v718_v61  ;;  %v701_v63 = vpop.xlane.xlu0 %700 }
 0x66b   : > { %1382 = vrsqrt.f32 %v717_v62  ;;  %v707_v2 = vmul.f32 0.0625, %v701_v63 }
 0x66d   : > { %v719_v7 = vadd.f32 1e-05, %v707_v2 }
 0x66e   : > { %v704_v8 = vpop.xlane.xlu1 %703  ;;  %v1356_v0 = vpop.permute.xlu0 %1355 }
 0x66f   : > { %1384 = vrsqrt.f32 %v719_v7  ;;  %v708_v1 = vmul.f32 0.0625, %v704_v8  ;;  %v1358_v9 = vunpack.i.h.bf16 %v1356_v0  ;;  %v1357_v10 = vunpack.i.l.bf16 %v1356_v0 }
 0x671   : > { %v720_v11 = vadd.f32 1e-05, %v708_v1  ;;  %v1306_v12 = vpack.c.bf16 %v1358_v9, %v1357_v10 }
 0x672   : > { %v1361_v19 = vpop.permute.xlu1 %1360 }
 0x673   : > { %1386 = vrsqrt.f32 %v720_v11  ;;  %1307 = vmatprep.subr.bf16.mxu1 %v1306_v12  ;;  %v1363_v21 = vunpack.i.h.bf16 %v1361_v19  ;;  %v1362_v22 = vunpack.i.l.bf16 %v1361_v19 }
 0x674   : > { %v1381_v14 = vpop.eup %1380  ;;  %1309 = vmatpush3.bf16.msra.mxu1 %v1306_v12 }
 0x675   : > { %v1383_v16 = vpop.eup %1382  ;;  %v726_v17 = vmul.f32 %v1381_v14, %v714_v13  ;;  %v1310_v25 = vpack.c.bf16 %v1363_v21, %v1362_v22 }
 0x676   : > { %v725_v20 = vmul.f32 %v1383_v16, %v713_v15 }
 0x677   : > { %v734_v27 = vadd.f32 %v1149_v18, %v726_v17  ;;  %1312 = vmatprep.subr.msk.bf16.mxu0 %vm1311_vm3, %v1310_v25 }
 0x678   : > { %v733_v24 = vadd.f32 %v1149_v18, %v725_v20  ;;  %1315 = vmatpush3.bf16.xpose.msk.msra.mxu0 %vm1311_vm3, %v1310_v25 }
 0x679   : > { %v1385_v26 = vpop.eup %1384 }
 0x67a   : > { %1262 = vmatprep.mubr.msk.f32.mxu1 %vm185_vm0, %v733_v24  ;;  %v727_v28 = vmul.f32 %v1385_v26, %v715_v23 }
 0x67b   : > { %1263 = vmatmul.mubr.msk.f32.vlgmr.msra.gmra.mrb[4].mxu1 %vm185_vm0, %v734_v27 }
 0x67c   : > { %v735_v30 = vadd.f32 %v1149_v18, %v727_v28 }
 0x67d   : > { %v1387_v31 = vpop.eup %1386 }
 0x67e   : > { %1265 = vmatprep.mubr.msk.f32.mxu1 %vm185_vm0, %v735_v30  ;;  %v728_v32 = vmul.f32 %v1387_v31, %v716_v29  ;;  %v1162_v31 = vld [vmem:[%s1590_s2 + $0x6] ss:$0 sm:$0xff] }
 0x680   : > { %v736_v33 = vadd.f32 %v1149_v18, %v728_v32 }
 0x682   : > { %1266 = vmatmul.mubr.msk.f32.gmra.mrb[6].mxu1 %vm185_vm0, %v736_v33 }
 0x74e   : > { %v1264_v35 = vpop.f32.mrb[4].mxu1 }
 0x74f   : > { %v832_v36 = vadd.f32 %v1264_v35, %v1150_v34  ;;  %v826_v37 = vpop.f32.mrb[5].mxu1 }
 0x750   : > { %v827_v38 = vadd.f32 %v1150_v34, %v826_v37 }
 0x751   : > { %v846_v3 = vmax.f32 %v832_v36, 0.0  ;;  %v1163_v36 = vld [vmem:[%s1590_s2 + $0x7] ss:$0 sm:$0xff] }
 0x752   : > { %v845_v4 = vmax.f32 %v827_v38, 0.0 }
 0x754   : > { %1272 = vmatprep.mubr.msk.f32.mxu0 %vm396_vm2, %v845_v4 }
 0x755   : > { %v1267_v39 = vpop.f32.mrb[6].mxu1  ;;  %1273 = vmatmul.mubr.msk.f32.vlgmr.msra.gmra.mrb[12].mxu0 %vm396_vm2, %v846_v3 }
 0x756   : > { %v842_v40 = vadd.f32 %v1267_v39, %v1150_v34  ;;  %v836_v41 = vpop.f32.mrb[7].mxu1 }
 0x757   : > { %v837_v42 = vadd.f32 %v1150_v34, %v836_v41 }
 0x758   : > { %v848_v44 = vmax.f32 %v842_v40, 0.0 }
 0x759   : > { %v847_v43 = vmax.f32 %v837_v42, 0.0 }
 0x75b   : > { %1275 = vmatprep.mubr.msk.f32.mxu0 %vm396_vm2, %v847_v43 }
 0x75c   : > { %1276 = vmatmul.mubr.msk.f32.gmra.mrb[14].mxu0 %vm396_vm2, %v848_v44 }
 0x828   : > { %v1274_v46 = vpop.f32.mrb[12].mxu0 }
 0x829   : > { %v946_v47 = vadd.f32 %v1274_v46, %v1155_v45  ;;  %v940_v5 = vpop.f32.mrb[13].mxu0 }
 0x82a   : > { %v941_v48 = vadd.f32 %v1155_v45, %v940_v5 }
 0x82b   : > { %v960_v6 = vadd.f32 %v946_v47, %v734_v27 }
 0x82c   : > { %v959_v49 = vadd.f32 %v941_v48, %v733_v24 }
 0x82d   : > { %v968_v50 = vsel %vm185_vm0, %v960_v6, 0.0 }
 0x82e   : > { %969 = vadd.xlane.f32.xlu0 %v968_v50  ;;  %v965_v51 = vsel %vm185_vm0, %v959_v49, 0.0 }
 0x82f   : > { %v1277_v52 = vpop.f32.mrb[14].mxu0  ;;  %966 = vadd.xlane.f32.xlu1 %v965_v51 }
 0x830   : > { %v956_v53 = vadd.f32 %v1277_v52, %v1155_v45  ;;  %v950_v55 = vpop.f32.mrb[15].mxu0 }
 0x831   : > { %v951_v56 = vadd.f32 %v1155_v45, %v950_v55 }
 0x832   : > { %v962_v57 = vadd.f32 %v956_v53, %v736_v33 }
 0x833   : > { %v961_v58 = vadd.f32 %v951_v56, %v735_v30 }
 0x834   : > { %v974_v59 = vsel %vm185_vm0, %v962_v57, 0.0 }
 0x835   : > { %975 = vadd.xlane.f32.xlu1 %v974_v59  ;;  %v971_v60 = vsel %vm185_vm0, %v961_v58, 0.0 }
 0x836   : > { %972 = vadd.xlane.f32.xlu0 %v971_v60 }
 0x8bb   : > { %v970_v61 = vpop.xlane.xlu0 %969 }
 0x8bc   : > { %v978_v62 = vmul.f32 0.0625, %v970_v61  ;;  %v967_v63 = vpop.xlane.xlu1 %966 }
 0x8bd   : > { %v977_v2 = vmul.f32 0.0625, %v967_v63 }
 0x8be   : > { %v982_v7 = vsub.f32 %v960_v6, %v978_v62 }
 0x8bf   : > { %v981_v8 = vsub.f32 %v959_v49, %v977_v2 }
 0x8c0   : > { %v986_v0 = vmul.f32 %v982_v7, %v982_v7  ;;  %v1010_v33 = vmul.f32 %v1162_v31, %v982_v7 }
 0x8c1   : > { %v985_v1 = vmul.f32 %v981_v8, %v981_v8  ;;  %v1009_v35 = vmul.f32 %v1162_v31, %v981_v8 }
 0x8c2   : > { %v976_v9 = vpop.xlane.xlu1 %975  ;;  %v992_v10 = vsel %vm185_vm0, %v986_v0, 0.0 }
 0x8c3   : > { %v980_v54 = vmul.f32 0.0625, %v976_v9  ;;  %v973_v11 = vpop.xlane.xlu0 %972  ;;  %993 = vadd.xlane.f32.xlu1 %v992_v10  ;;  %v989_v12 = vsel %vm185_vm0, %v985_v1, 0.0 }
 0x8c4   : > { %v979_v13 = vmul.f32 0.0625, %v973_v11  ;;  %990 = vadd.xlane.f32.xlu0 %v989_v12 }
 0x8c5   : > { %v984_v14 = vsub.f32 %v962_v57, %v980_v54 }
 0x8c6   : > { %v983_v15 = vsub.f32 %v961_v58, %v979_v13 }
 0x8c7   : > { %v988_v16 = vmul.f32 %v984_v14, %v984_v14  ;;  %v1012_v41 = vmul.f32 %v1162_v31, %v984_v14 }
 0x8c8   : > { %v987_v17 = vmul.f32 %v983_v15, %v983_v15  ;;  %v1011_v44 = vmul.f32 %v1162_v31, %v983_v15 }
 0x8c9   : > { %v998_v18 = vsel %vm185_vm0, %v988_v16, 0.0 }
 0x8ca   : > { %999 = vadd.xlane.f32.xlu1 %v998_v18  ;;  %v995_v19 = vsel %vm185_vm0, %v987_v17, 0.0 }
 0x8cb   : > { %996 = vadd.xlane.f32.xlu0 %v995_v19 }
 0x950   : > { %v994_v20 = vpop.xlane.xlu1 %993 }
 0x951   : > { %v1002_v21 = vmul.f32 0.0625, %v994_v20  ;;  %v991_v22 = vpop.xlane.xlu0 %990 }
 0x952   : > { %v1001_v23 = vmul.f32 0.0625, %v991_v22 }
 0x953   : > { %v1014_v24 = vadd.f32 1e-05, %v1002_v21 }
 0x954   : > { %v1013_v25 = vadd.f32 1e-05, %v1001_v23 }
 0x955   : > { %1388 = vrsqrt.f32 %v1014_v24 }
 0x956   : > { %1390 = vrsqrt.f32 %v1013_v25 }
 0x957   : > { %v1000_v26 = vpop.xlane.xlu1 %999 }
 0x958   : > { %v1004_v27 = vmul.f32 0.0625, %v1000_v26  ;;  %v997_v28 = vpop.xlane.xlu0 %996 }
 0x959   : > { %v1003_v29 = vmul.f32 0.0625, %v997_v28 }
 0x95a   : > { %v1016_v30 = vadd.f32 1e-05, %v1004_v27 }
 0x95b   : > { %v1015_v32 = vadd.f32 1e-05, %v1003_v29 }
 0x95c   : > { %1392 = vrsqrt.f32 %v1016_v30 }
 0x95d   : > { %1394 = vrsqrt.f32 %v1015_v32 }
 0x95f   : > { %v1389_v34 = vpop.eup %1388 }
 0x960   : > { %v1391_v37 = vpop.eup %1390  ;;  %v1022_v38 = vmul.f32 %v1389_v34, %v1010_v33 }
 0x961   : > { %v1021_v4 = vmul.f32 %v1391_v37, %v1009_v35 }
 0x962   : > { %v1030_v3 = vadd.f32 %v1163_v36, %v1022_v38 }
 0x963   : > { %v1029_v39 = vadd.f32 %v1163_v36, %v1021_v4 }
 0x964   : > { %v1165_v40 = vmul.f32 -1.442695, %v1030_v3 }
 0x965   : > { %v1164_v42 = vmul.f32 -1.442695, %v1029_v39 }
 0x966   : > { %v1393_v43 = vpop.eup %1392  ;;  %1396 = vpow2.f32 %v1165_v40 }
 0x967   : > { %v1395_v45 = vpop.eup %1394  ;;  %1398 = vpow2.f32 %v1164_v42  ;;  %v1024_v46 = vmul.f32 %v1393_v43, %v1012_v41 }
 0x968   : > { %v1023_v47 = vmul.f32 %v1395_v45, %v1011_v44 }
 0x969   : > { %v1032_v5 = vadd.f32 %v1163_v36, %v1024_v46 }
 0x96a   : > { %v1031_v48 = vadd.f32 %v1163_v36, %v1023_v47 }
 0x96b   : > { %v1167_v6 = vmul.f32 -1.442695, %v1032_v5 }
 0x96c   : > { %v1166_v49 = vmul.f32 -1.442695, %v1031_v48 }
 0x96d   : > { %1400 = vpow2.f32 %v1167_v6 }
 0x96e   : > { %1402 = vpow2.f32 %v1166_v49 }
 0x970   : > { %v1397_v50 = vpop.eup %1396 }
 0x971   : > { %v1399_v51 = vpop.eup %1398  ;;  %v1046_v52 = vadd.f32 1.0, %v1397_v50 }
 0x972   : > { %v1045_v53 = vadd.f32 1.0, %v1399_v51 }
 0x974   : > { %1404 = vrcp.f32 %v1045_v53 }
 0x975   : > { %1406 = vrcp.f32 %v1046_v52 }
 0x977   : > { %v1401_v55 = vpop.eup %1400 }
 0x978   : > { %v1403_v56 = vpop.eup %1402  ;;  %v1048_v57 = vadd.f32 1.0, %v1401_v55 }
 0x979   : > { %v1047_v58 = vadd.f32 1.0, %v1403_v56 }
 0x97b   : > { %1408 = vrcp.f32 %v1047_v58 }
 0x97c   : > { %1410 = vrcp.f32 %v1048_v57 }
 0x97e   : > { %v1405_v59 = vpop.eup %1404 }
 0x97f   : > { %v1407_v60 = vpop.eup %1406  ;;  %1057 = vst.msk [vmem:[%s172_s22] sm:$0xff] %vm185_vm0, %v1405_v59 }
 0x980   : > { %1058 = vst.msk [vmem:[%s172_s22 + $0x8] sm:$0xff] %vm185_vm0, %v1407_v60 }
 0x985   : > { %v1409_v61 = vpop.eup %1408 }
 0x986   : > { %v1411_v62 = vpop.eup %1410  ;;  %1059 = vst.msk [vmem:[%s172_s22 + $0x10] sm:$0xff] %vm185_vm0, %v1409_v61 }
 0x987   : > { %1060 = vst.msk [vmem:[%s172_s22 + $0x18] sm:$0xff] %vm185_vm0, %v1411_v62 }
 0x988 PF: > { %s13_s12 = sadd.s32 1, %s1418_s12  }
 0x989   : > { %p10_p4 = scmp.ge.s32.totalorder %s13_s12, 4  }
 0x98b   :  { %12 = sbr.rel (!%p10_p4) target bundleno = 1 (0x1), region = 62 }

</bundles_post_ra>
